<compile_context>
chip_gen: v7x
topology: tpu7x:2x2x1
jax: 0.10.0
libtpu: 0.0.40
codegen_flags: <defaults>
</compile_context>

<pallas_src>
import functools
import math

import jax
import jax.numpy as jnp
from jax import lax
from jax.experimental import pallas as pl
from jax.experimental.pallas import tpu as pltpu

LN_EPS = 1e-5

WEIGHT_ORDER = ("ln1_w", "ln1_b", "wqkv", "bqkv", "wo", "bo",
                "ln2_w", "ln2_b", "wfc", "bfc", "wpr", "bpr")


def _layernorm(v, w_1d, b_1d):
    # v: (M, D) f32; w/b: (1, D) f32.
    mu = jnp.mean(v, axis=-1, keepdims=True)
    var = jnp.mean((v - mu) ** 2, axis=-1, keepdims=True)
    return (v - mu) * lax.rsqrt(var + LN_EPS) * w_1d + b_1d


def transformer_kernel(x_ref, ln1w_ref, ln1b_ref, wqkv_ref, bqkv_ref,
                       wo_ref, bo_ref, ln2w_ref, ln2b_ref,
                       wfc_ref, bfc_ref, wpr_ref, bpr_ref,
                       o_ref, x_sc, hv_sc, h2_sc, *, heads):
    # Grid: (batch-block n, layer l, ffn-tile t).  x block: (Bn, L, D).
    # Weight blocks are (1, ...) slices of the (layers, ...) stacks; wfc/bfc/wpr are
    # additionally tiled along the MLP hidden dim by t.
    Bn, L, D = x_ref.shape
    M = Bn * L
    hd = D // heads
    scale = 1.0 / math.sqrt(hd)
    layer = pl.program_id(1)
    tile = pl.program_id(2)
    last_layer = pl.num_programs(1) - 1
    last_tile = pl.num_programs(2) - 1

    @pl.when(jnp.logical_and(layer == 0, tile == 0))
    def _():
        # Initialize the f32 VMEM carry with this batch block's input.
        x_sc[...] = x_ref[...].reshape(M, D).astype(jnp.float32)

    @pl.when(tile == 0)
    def _():
        x = x_sc[...]                                                 # (M, D) f32

        # ---- attention branch (pre-LN) ----
        h = _layernorm(x, ln1w_ref[0], ln1b_ref[0])
        qkv = jnp.dot(h.astype(jnp.bfloat16), wqkv_ref[0],
                      preferred_element_type=jnp.float32) + bqkv_ref[0]   # (M, 3D) f32
        # scale folded into q; cast to bf16 once, slice heads from bf16 tensors
        q_bf = (qkv[:, :D] * scale).astype(jnp.bfloat16)
        k_bf = qkv[:, D:2 * D].astype(jnp.bfloat16)
        v_bf = qkv[:, 2 * D:].astype(jnp.bfloat16)

        for hi in range(heads):                                       # static unroll
            cs = slice(hi * hd, (hi + 1) * hd)
            q = q_bf[:, cs].reshape(Bn, L, hd)
            k = k_bf[:, cs].reshape(Bn, L, hd)
            v = v_bf[:, cs].reshape(Bn, L, hd)
            s = jnp.einsum("bqd,bkd->bqk", q, k,
                           preferred_element_type=jnp.float32)        # (Bn, L, L) f32
            s = s - jnp.max(s, axis=-1, keepdims=True)
            e = jnp.exp(s)
            a = e * pl.reciprocal(jnp.sum(e, axis=-1, keepdims=True), approx=False)
            hv = jnp.einsum("bqk,bkd->bqd", a.astype(jnp.bfloat16), v,
                            preferred_element_type=jnp.float32)       # (Bn, L, hd)
            # stash per-head output; output projection done once, full depth, after loop
            hv_sc[:, cs] = hv.reshape(M, hd).astype(jnp.bfloat16)

        o_proj = jnp.dot(hv_sc[...], wo_ref[0],
                         preferred_element_type=jnp.float32) + bo_ref[0]  # (M, D)
        x = x + o_proj                                                # residual 1

        # ---- MLP branch (pre-LN), hidden dim handled per ffn-tile below ----
        h2 = _layernorm(x, ln2w_ref[0], ln2b_ref[0])
        h2_sc[...] = h2.astype(jnp.bfloat16)
        x_sc[...] = x + bpr_ref[0]          # pre-add c_proj bias once per layer

    # FFN tile t: x_sc += QuickGELU(h2 @ wfc_t + bfc_t) @ wpr_t
    m = jnp.dot(h2_sc[...], wfc_ref[0],
                preferred_element_type=jnp.float32) + bfc_ref[0]      # (M, 4D/T) f32
    m = m * pl.reciprocal(1.0 + jnp.exp(-1.702 * m), approx=True)     # QuickGELU
    x_sc[...] = x_sc[...] + jnp.dot(m.astype(jnp.bfloat16), wpr_ref[0],
                                    preferred_element_type=jnp.float32)

    @pl.when(jnp.logical_and(layer == last_layer, tile == last_tile))
    def _():
        o_ref[...] = x_sc[...].reshape(Bn, L, D).astype(o_ref.dtype)


# ------------------------------- wrapper / tiling heuristics ---------------------------
def _pick_batch_block(n, max_block=8):
    for b in range(min(n, max_block), 0, -1):
        if n % b == 0:
            return b
    return 1


def _vmem_limit_bytes():
    cap = 128 * 1024 * 1024
    try:
        cap = int(getattr(pltpu.get_tpu_info(), "vmem_capacity_bytes", cap))
    except Exception:
        pass
    return (cap * 3) // 4          # ~25% headroom below physical VMEM


def _pick_ffn_tiles(d, vmem_limit):
    # Choose the smallest T whose double-buffered per-step bf16 weight footprint fits
    # comfortably; tile width must stay a multiple of 128 lanes (unless T == 1).
    attn_w = (d * 3 * d + d * d) * 2                     # wqkv + wo, bf16 bytes
    chosen = 1
    for t in (1, 2, 4, 8):
        if (4 * d) % t != 0:
            continue
        tw = (4 * d) // t
        if t > 1 and tw % 128 != 0:
            continue
        chosen = t
        ffn_w = 2 * d * tw * 2                           # wfc tile + wpr tile
        if 2 * (attn_w + ffn_w) <= int(vmem_limit * 0.6):
            return t
    return chosen


def transformer_forward(x_lnd, params, heads, *, batch_block=None, ffn_tiles=None):
    """Matches Transformer.forward.  x_lnd: (L, N, D), PyTorch seq-first layout."""
    x = jnp.transpose(x_lnd, (1, 0, 2))                  # -> (N, L, D)
    N, L, D = x.shape
    layers = params["wqkv"].shape[0]
    assert D % heads == 0

    Bn = batch_block if batch_block is not None else _pick_batch_block(N)
    assert N % Bn == 0, "batch block must divide batch size"
    vmem_limit = _vmem_limit_bytes()
    T = ffn_tiles if ffn_tiles is not None else _pick_ffn_tiles(D, vmem_limit)
    assert (4 * D) % T == 0
    Dh = (4 * D) // T

    args = [params[k] for k in WEIGHT_ORDER]             # each (layers, A, B)
    layer_map = lambda n, l, t: (l, 0, 0)
    in_specs = [
        pl.BlockSpec((Bn, L, D), lambda n, l, t: (n, 0, 0)),     # x
        pl.BlockSpec((1, 1, D), layer_map),                      # ln1_w
        pl.BlockSpec((1, 1, D), layer_map),                      # ln1_b
        pl.BlockSpec((1, D, 3 * D), layer_map),                  # wqkv
        pl.BlockSpec((1, 1, 3 * D), layer_map),                  # bqkv
        pl.BlockSpec((1, D, D), layer_map),                      # wo
        pl.BlockSpec((1, 1, D), layer_map),                      # bo
        pl.BlockSpec((1, 1, D), layer_map),                      # ln2_w
        pl.BlockSpec((1, 1, D), layer_map),                      # ln2_b
        pl.BlockSpec((1, D, Dh), lambda n, l, t: (l, 0, t)),     # wfc tile
        pl.BlockSpec((1, 1, Dh), lambda n, l, t: (l, 0, t)),     # bfc tile
        pl.BlockSpec((1, Dh, D), lambda n, l, t: (l, t, 0)),     # wpr tile
        pl.BlockSpec((1, 1, D), layer_map),                      # bpr
    ]

    out = pl.pallas_call(
        functools.partial(transformer_kernel, heads=heads),
        out_shape=jax.ShapeDtypeStruct((N, L, D), x.dtype),
        grid=(N // Bn, layers, T),
        in_specs=in_specs,
        out_specs=pl.BlockSpec((Bn, L, D), lambda n, l, t: (n, 0, 0)),
        scratch_shapes=[
            pltpu.VMEM((Bn * L, D), jnp.float32),    # x carry across layers (f32)
            pltpu.VMEM((Bn * L, D), jnp.bfloat16),   # per-head attention outputs
            pltpu.VMEM((Bn * L, D), jnp.bfloat16),   # ln2(x) input to the FFN tiles
        ],
        compiler_params=pltpu.CompilerParams(
            dimension_semantics=("parallel", "arbitrary", "arbitrary"),
            vmem_limit_bytes=int(vmem_limit)),
    )(x, *args)
    return jnp.transpose(out, (1, 0, 2))                 # back to (L, N, D)


# ----------------- deterministic parameter init (weights stacked over layers) ----------
def init_params(key, width, layers):
    D = width
    s = 0.02
    ks = jax.random.split(key, 12)
    rnd = lambda k, shape: s * jax.random.normal(k, shape, jnp.float32)
    return dict(
        ln1_w=1.0 + 0.1 * jax.random.normal(ks[0], (layers, 1, D), jnp.float32),
        ln1_b=0.1 * jax.random.normal(ks[1], (layers, 1, D), jnp.float32),
        # weights stored so that y = x @ W + b (torch weight transposed); MXU weights bf16
        wqkv=rnd(ks[2], (layers, D, 3 * D)).astype(jnp.bfloat16),
        bqkv=rnd(ks[3], (layers, 1, 3 * D)),
        wo=rnd(ks[4], (layers, D, D)).astype(jnp.bfloat16),
        bo=rnd(ks[5], (layers, 1, D)),
        ln2_w=1.0 + 0.1 * jax.random.normal(ks[6], (layers, 1, D), jnp.float32),
        ln2_b=0.1 * jax.random.normal(ks[7], (layers, 1, D), jnp.float32),
        wfc=rnd(ks[8], (layers, D, 4 * D)).astype(jnp.bfloat16),
        bfc=rnd(ks[9], (layers, 1, 4 * D)),
        wpr=rnd(ks[10], (layers, 4 * D, D)).astype(jnp.bfloat16),
        bpr=rnd(ks[11], (layers, 1, D)),
    )


# ----------------- pure-JAX f32 reference (same math, no Pallas) -----------------------
def ref_transformer(x_lnd, p, heads):
    x = jnp.transpose(x_lnd, (1, 0, 2)).astype(jnp.float32)   # (N, L, D)
    N, L, D = x.shape
    hd = D // heads
    layers = p["wqkv"].shape[0]

    def ln(v, w, b):
        mu = v.mean(-1, keepdims=True)
        var = ((v - mu) ** 2).mean(-1, keepdims=True)
        return (v - mu) / jnp.sqrt(var + LN_EPS) * w + b

    for l in range(layers):
        g = lambda name: p[name][l].astype(jnp.float32)
        h = ln(x, g("ln1_w")[0], g("ln1_b")[0])
        qkv = h @ g("wqkv") + g("bqkv")[0]
        q, k, v = jnp.split(qkv, 3, axis=-1)
        q = q.reshape(N, L, heads, hd).transpose(0, 2, 1, 3)
        k = k.reshape(N, L, heads, hd).transpose(0, 2, 1, 3)
        v = v.reshape(N, L, heads, hd).transpose(0, 2, 1, 3)
        s = jnp.einsum("nhqd,nhkd->nhqk", q, k) / math.sqrt(hd)
        a = jax.nn.softmax(s, axis=-1)
        o = jnp.einsum("nhqk,nhkd->nhqd", a, v).transpose(0, 2, 1, 3).reshape(N, L, D)
        x = x + o @ g("wo") + g("bo")[0]
        h2 = ln(x, g("ln2_w")[0], g("ln2_b")[0])
        m = h2 @ g("wfc") + g("bfc")[0]
        m = m * jax.nn.sigmoid(1.702 * m)
        x = x + m @ g("wpr") + g("bpr")[0]
    return jnp.transpose(x, (1, 0, 2))


if __name__ == "__main__":
    width, layers, heads = 32, 2, 4
    L, N = 8, 2  # seq, batch

    key = jax.random.PRNGKey(0)
    kx, kp = jax.random.split(key)
    x = jax.random.normal(kx, (L, N, width), jnp.float32)   # PyTorch seq-first layout
    params = init_params(kp, width, layers)

    out = jax.block_until_ready(transformer_forward(x, params, heads))
    ref = jax.block_until_ready(ref_transformer(x, params, heads))

    assert out.shape == (L, N, width)
    max_err = float(jnp.max(jnp.abs(out - ref)))
    assert max_err < 2e-2, f"mismatch vs reference: {max_err}"

    print("KERNEL_OK")
</pallas_src>

<mosaic_0001>
module attributes {stable_mosaic.version = 11 : i64} {
  func.func @transformer_kernel(%arg0: i32, %arg1: i32, %arg2: i32, %arg3: memref<2x8x32xf32, #tpu.memory_space<vmem>>, %arg4: memref<1x1x32xf32, #tpu.memory_space<vmem>>, %arg5: memref<1x1x32xf32, #tpu.memory_space<vmem>>, %arg6: memref<1x32x96xbf16, #tpu.memory_space<vmem>>, %arg7: memref<1x1x96xf32, #tpu.memory_space<vmem>>, %arg8: memref<1x32x32xbf16, #tpu.memory_space<vmem>>, %arg9: memref<1x1x32xf32, #tpu.memory_space<vmem>>, %arg10: memref<1x1x32xf32, #tpu.memory_space<vmem>>, %arg11: memref<1x1x32xf32, #tpu.memory_space<vmem>>, %arg12: memref<1x32x128xbf16, #tpu.memory_space<vmem>>, %arg13: memref<1x1x128xf32, #tpu.memory_space<vmem>>, %arg14: memref<1x128x32xbf16, #tpu.memory_space<vmem>>, %arg15: memref<1x1x32xf32, #tpu.memory_space<vmem>>, %arg16: memref<2x8x32xf32, #tpu.memory_space<vmem>>, %arg17: memref<16x32xf32, #tpu.memory_space<vmem>>, %arg18: memref<16x32xbf16, #tpu.memory_space<vmem>>, %arg19: memref<16x32xbf16, #tpu.memory_space<vmem>>) attributes {dimension_semantics = [#tpu.dimension_semantics<parallel>, #tpu.dimension_semantics<arbitrary>, #tpu.dimension_semantics<arbitrary>], iteration_bounds = array<i64: 1, 2, 1>, scalar_prefetch = 0 : i64, scratch_operands = 3 : i64, tpu.core_type = #tpu.core_type<tc>, window_params = [{transform_indices = @transform_0, window_bounds = array<i64: 2, 8, 32>}, {transform_indices = @transform_1, window_bounds = array<i64: 1, 1, 32>}, {transform_indices = @transform_2, window_bounds = array<i64: 1, 1, 32>}, {transform_indices = @transform_3, window_bounds = array<i64: 1, 32, 96>}, {transform_indices = @transform_4, window_bounds = array<i64: 1, 1, 96>}, {transform_indices = @transform_5, window_bounds = array<i64: 1, 32, 32>}, {transform_indices = @transform_6, window_bounds = array<i64: 1, 1, 32>}, {transform_indices = @transform_7, window_bounds = array<i64: 1, 1, 32>}, {transform_indices = @transform_8, window_bounds = array<i64: 1, 1, 32>}, {transform_indices = @transform_9, window_bounds = array<i64: 1, 32, 128>}, {transform_indices = @transform_10, window_bounds = array<i64: 1, 1, 128>}, {transform_indices = @transform_11, window_bounds = array<i64: 1, 128, 32>}, {transform_indices = @transform_12, window_bounds = array<i64: 1, 1, 32>}, {transform_indices = @transform_13, window_bounds = array<i64: 2, 8, 32>}]} {
    %c0_i32 = arith.constant 0 : i32
    %0 = arith.cmpi eq, %arg1, %c0_i32 : i32
    %c0_i32_0 = arith.constant 0 : i32
    %1 = arith.cmpi eq, %arg2, %c0_i32_0 : i32
    %2 = arith.andi %0, %1 : i1
    %3 = arith.extui %2 : i1 to i32
    %c0_i32_1 = arith.constant 0 : i32
    %4 = arith.cmpi ne, %3, %c0_i32_1 : i32
    scf.if %4 {
      %c0_23 = arith.constant 0 : index
      %c0_24 = arith.constant 0 : index
      %c0_25 = arith.constant 0 : index
      %35 = vector.load %arg3[%c0_23, %c0_24, %c0_25] : memref<2x8x32xf32, #tpu.memory_space<vmem>>, vector<2x8x32xf32>
      %36 = vector.shape_cast %35 : vector<2x8x32xf32> to vector<16x32xf32>
      %c0_26 = arith.constant 0 : index
      %c0_27 = arith.constant 0 : index
      %37 = vector.load %arg17[%c0_26, %c0_27] : memref<16x32xf32, #tpu.memory_space<vmem>>, vector<16x32xf32>
      tpu.vector_store %arg17[%c0_26, %c0_27], %36 {strides = array<i32>} : memref<16x32xf32, #tpu.memory_space<vmem>>, vector<16x32xf32>,
    } else {
    }
    %c0_i32_2 = arith.constant 0 : i32
    %5 = arith.cmpi eq, %arg2, %c0_i32_2 : i32
    %6 = arith.extui %5 : i1 to i32
    %c0_i32_3 = arith.constant 0 : i32
    %7 = arith.cmpi ne, %6, %c0_i32_3 : i32
    scf.if %7 {
      %c0_23 = arith.constant 0 : index
      %c0_24 = arith.constant 0 : index
      %35 = vector.load %arg17[%c0_23, %c0_24] : memref<16x32xf32, #tpu.memory_space<vmem>>, vector<16x32xf32>
      %c0_25 = arith.constant 0 : index
      %c0_26 = arith.constant 0 : index
      %c0_27 = arith.constant 0 : index
      %36 = vector.load %arg4[%c0_25, %c0_26, %c0_27] : memref<1x1x32xf32, #tpu.memory_space<vmem>>, vector<1x1x32xf32>
      %37 = vector.shape_cast %36 : vector<1x1x32xf32> to vector<1x32xf32>
      %c0_28 = arith.constant 0 : index
      %c0_29 = arith.constant 0 : index
      %c0_30 = arith.constant 0 : index
      %38 = vector.load %arg5[%c0_28, %c0_29, %c0_30] : memref<1x1x32xf32, #tpu.memory_space<vmem>>, vector<1x1x32xf32>
      %39 = vector.shape_cast %38 : vector<1x1x32xf32> to vector<1x32xf32>
      %cst_31 = arith.constant dense<0.000000e+00> : vector<16xf32>
      %40 = vector.multi_reduction <add>, %35, %cst_31 [1] : vector<16x32xf32> to vector<16xf32>
      %41 = vector.shape_cast %40 : vector<16xf32> to vector<16x1xf32>
      %cst_32 = arith.constant 3.200000e+01 : f32
      %42 = vector.broadcast %cst_32 : f32 to vector<16x1xf32>
      %43 = arith.divf %41, %42 : vector<16x1xf32>
      %44 = vector.broadcast %43 : vector<16x1xf32> to vector<16x32xf32>
      %45 = arith.subf %35, %44 : vector<16x32xf32>
      %46 = arith.mulf %45, %45 : vector<16x32xf32>
      %cst_33 = arith.constant dense<0.000000e+00> : vector<16xf32>
      %47 = vector.multi_reduction <add>, %46, %cst_33 [1] : vector<16x32xf32> to vector<16xf32>
      %48 = vector.shape_cast %47 : vector<16xf32> to vector<16x1xf32>
      %cst_34 = arith.constant 3.200000e+01 : f32
      %49 = vector.broadcast %cst_34 : f32 to vector<16x1xf32>
      %50 = arith.divf %48, %49 : vector<16x1xf32>
      %51 = vector.broadcast %43 : vector<16x1xf32> to vector<16x32xf32>
      %52 = arith.subf %35, %51 : vector<16x32xf32>
      %cst_35 = arith.constant 9.99999974E-6 : f32
      %53 = vector.broadcast %cst_35 : f32 to vector<16x1xf32>
      %54 = arith.addf %50, %53 : vector<16x1xf32>
      %55 = math.rsqrt %54 : vector<16x1xf32>
      %56 = vector.broadcast %55 : vector<16x1xf32> to vector<16x32xf32>
      %57 = arith.mulf %52, %56 : vector<16x32xf32>
      %58 = vector.broadcast %37 : vector<1x32xf32> to vector<16x32xf32>
      %59 = arith.mulf %57, %58 : vector<16x32xf32>
      %60 = vector.broadcast %39 : vector<1x32xf32> to vector<16x32xf32>
      %61 = arith.addf %59, %60 : vector<16x32xf32>
      %62 = arith.truncf %61 : vector<16x32xf32> to vector<16x32xbf16>
      %c0_36 = arith.constant 0 : index
      %c0_37 = arith.constant 0 : index
      %c0_38 = arith.constant 0 : index
      %63 = vector.load %arg6[%c0_36, %c0_37, %c0_38] : memref<1x32x96xbf16, #tpu.memory_space<vmem>>, vector<1x32x96xbf16>
      %64 = vector.shape_cast %63 : vector<1x32x96xbf16> to vector<32x96xbf16>
      %cst_39 = arith.constant dense<0.000000e+00> : vector<16x96xf32>
      %65 = tpu.matmul %62, %64, %cst_39 {dimension_numbers = #tpu.dot_dimension_numbers<[1], [0], [0], [1], [0, 0, 1, 1], [], []>} : vector<16x32xbf16>, vector<32x96xbf16>, vector<16x96xf32> -> vector<16x96xf32>
      %c0_40 = arith.constant 0 : index
      %c0_41 = arith.constant 0 : index
      %c0_42 = arith.constant 0 : index
      %66 = vector.load %arg7[%c0_40, %c0_41, %c0_42] : memref<1x1x96xf32, #tpu.memory_space<vmem>>, vector<1x1x96xf32>
      %67 = vector.shape_cast %66 : vector<1x1x96xf32> to vector<1x96xf32>
      %68 = vector.broadcast %67 : vector<1x96xf32> to vector<16x96xf32>
      %69 = arith.addf %65, %68 : vector<16x96xf32>
      %70 = vector.extract_strided_slice %69 {offsets = [0, 0], sizes = [16, 32], strides = [1, 1]} : vector<16x96xf32> to vector<16x32xf32>
      %cst_43 = arith.constant 0.353553385 : f32
      %71 = vector.broadcast %cst_43 : f32 to vector<16x32xf32>
      %72 = arith.mulf %70, %71 : vector<16x32xf32>
      %73 = arith.truncf %72 : vector<16x32xf32> to vector<16x32xbf16>
      %74 = vector.extract_strided_slice %69 {offsets = [0, 32], sizes = [16, 32], strides = [1, 1]} : vector<16x96xf32> to vector<16x32xf32>
      %75 = arith.truncf %74 : vector<16x32xf32> to vector<16x32xbf16>
      %76 = vector.extract_strided_slice %69 {offsets = [0, 64], sizes = [16, 32], strides = [1, 1]} : vector<16x96xf32> to vector<16x32xf32>
      %77 = arith.truncf %76 : vector<16x32xf32> to vector<16x32xbf16>
      %78 = vector.extract_strided_slice %73 {offsets = [0, 0], sizes = [16, 8], strides = [1, 1]} : vector<16x32xbf16> to vector<16x8xbf16>
      %79 = vector.shape_cast %78 : vector<16x8xbf16> to vector<2x8x8xbf16>
      %80 = vector.extract_strided_slice %75 {offsets = [0, 0], sizes = [16, 8], strides = [1, 1]} : vector<16x32xbf16> to vector<16x8xbf16>
      %81 = vector.shape_cast %80 : vector<16x8xbf16> to vector<2x8x8xbf16>
      %82 = vector.extract_strided_slice %77 {offsets = [0, 0], sizes = [16, 8], strides = [1, 1]} : vector<16x32xbf16> to vector<16x8xbf16>
      %83 = vector.shape_cast %82 : vector<16x8xbf16> to vector<2x8x8xbf16>
      "tpu.trace_start"() <{level = 10 : i32, message = "bqd,bkd->bqk"}> : () -> ()
      %cst_44 = arith.constant dense<0.000000e+00> : vector<2x8x8xf32>
      %84 = tpu.matmul %79, %81, %cst_44 {dimension_numbers = #tpu.dot_dimension_numbers<[2], [2], [1], [1], [0, 0, 0, 1, 1, 1], [0], [0]>} : vector<2x8x8xbf16>, vector<2x8x8xbf16>, vector<2x8x8xf32> -> vector<2x8x8xf32>
      "tpu.trace_stop"() : () -> ()
      %cst_45 = arith.constant dense<0xFF800000> : vector<2x8xf32>
      %85 = vector.multi_reduction <maximumf>, %84, %cst_45 [2] : vector<2x8x8xf32> to vector<2x8xf32>
      %86 = vector.shape_cast %85 : vector<2x8xf32> to vector<2x8x1xf32>
      %87 = vector.broadcast %86 : vector<2x8x1xf32> to vector<2x8x8xf32>
      %88 = arith.subf %84, %87 : vector<2x8x8xf32>
      %89 = math.exp %88 : vector<2x8x8xf32>
      %cst_46 = arith.constant dense<0.000000e+00> : vector<2x8xf32>
      %90 = vector.multi_reduction <add>, %89, %cst_46 [2] : vector<2x8x8xf32> to vector<2x8xf32>
      %91 = vector.shape_cast %90 : vector<2x8xf32> to vector<2x8x1xf32>
      %92 = tpu.reciprocal %91 : vector<2x8x1xf32> -> vector<2x8x1xf32>
      %93 = vector.broadcast %92 : vector<2x8x1xf32> to vector<2x8x8xf32>
      %94 = arith.mulf %89, %93 : vector<2x8x8xf32>
      %95 = arith.truncf %94 : vector<2x8x8xf32> to vector<2x8x8xbf16>
      "tpu.trace_start"() <{level = 10 : i32, message = "bqk,bkd->bqd"}> : () -> ()
      %cst_47 = arith.constant dense<0.000000e+00> : vector<2x8x8xf32>
      %96 = tpu.matmul %95, %83, %cst_47 {dimension_numbers = #tpu.dot_dimension_numbers<[2], [1], [1], [2], [0, 0, 0, 1, 1, 2], [0], [0]>} : vector<2x8x8xbf16>, vector<2x8x8xbf16>, vector<2x8x8xf32> -> vector<2x8x8xf32>
      "tpu.trace_stop"() : () -> ()
      %97 = vector.shape_cast %96 : vector<2x8x8xf32> to vector<16x8xf32>
      %98 = arith.truncf %97 : vector<16x8xf32> to vector<16x8xbf16>
      %c0_48 = arith.constant 0 : index
      %c0_49 = arith.constant 0 : index
      %99 = vector.load %arg18[%c0_48, %c0_49] : memref<16x32xbf16, #tpu.memory_space<vmem>>, vector<16x8xbf16>
      tpu.vector_store %arg18[%c0_48, %c0_49], %98 {strides = array<i32>} : memref<16x32xbf16, #tpu.memory_space<vmem>>, vector<16x8xbf16>,
      %100 = vector.extract_strided_slice %73 {offsets = [0, 8], sizes = [16, 8], strides = [1, 1]} : vector<16x32xbf16> to vector<16x8xbf16>
      %101 = vector.shape_cast %100 : vector<16x8xbf16> to vector<2x8x8xbf16>
      %102 = vector.extract_strided_slice %75 {offsets = [0, 8], sizes = [16, 8], strides = [1, 1]} : vector<16x32xbf16> to vector<16x8xbf16>
      %103 = vector.shape_cast %102 : vector<16x8xbf16> to vector<2x8x8xbf16>
      %104 = vector.extract_strided_slice %77 {offsets = [0, 8], sizes = [16, 8], strides = [1, 1]} : vector<16x32xbf16> to vector<16x8xbf16>
      %105 = vector.shape_cast %104 : vector<16x8xbf16> to vector<2x8x8xbf16>
      "tpu.trace_start"() <{level = 10 : i32, message = "bqd,bkd->bqk"}> : () -> ()
      %cst_50 = arith.constant dense<0.000000e+00> : vector<2x8x8xf32>
      %106 = tpu.matmul %101, %103, %cst_50 {dimension_numbers = #tpu.dot_dimension_numbers<[2], [2], [1], [1], [0, 0, 0, 1, 1, 1], [0], [0]>} : vector<2x8x8xbf16>, vector<2x8x8xbf16>, vector<2x8x8xf32> -> vector<2x8x8xf32>
      "tpu.trace_stop"() : () -> ()
      %cst_51 = arith.constant dense<0xFF800000> : vector<2x8xf32>
      %107 = vector.multi_reduction <maximumf>, %106, %cst_51 [2] : vector<2x8x8xf32> to vector<2x8xf32>
      %108 = vector.shape_cast %107 : vector<2x8xf32> to vector<2x8x1xf32>
      %109 = vector.broadcast %108 : vector<2x8x1xf32> to vector<2x8x8xf32>
      %110 = arith.subf %106, %109 : vector<2x8x8xf32>
      %111 = math.exp %110 : vector<2x8x8xf32>
      %cst_52 = arith.constant dense<0.000000e+00> : vector<2x8xf32>
      %112 = vector.multi_reduction <add>, %111, %cst_52 [2] : vector<2x8x8xf32> to vector<2x8xf32>
      %113 = vector.shape_cast %112 : vector<2x8xf32> to vector<2x8x1xf32>
      %114 = tpu.reciprocal %113 : vector<2x8x1xf32> -> vector<2x8x1xf32>
      %115 = vector.broadcast %114 : vector<2x8x1xf32> to vector<2x8x8xf32>
      %116 = arith.mulf %111, %115 : vector<2x8x8xf32>
      %117 = arith.truncf %116 : vector<2x8x8xf32> to vector<2x8x8xbf16>
      "tpu.trace_start"() <{level = 10 : i32, message = "bqk,bkd->bqd"}> : () -> ()
      %cst_53 = arith.constant dense<0.000000e+00> : vector<2x8x8xf32>
      %118 = tpu.matmul %117, %105, %cst_53 {dimension_numbers = #tpu.dot_dimension_numbers<[2], [1], [1], [2], [0, 0, 0, 1, 1, 2], [0], [0]>} : vector<2x8x8xbf16>, vector<2x8x8xbf16>, vector<2x8x8xf32> -> vector<2x8x8xf32>
      "tpu.trace_stop"() : () -> ()
      %119 = vector.shape_cast %118 : vector<2x8x8xf32> to vector<16x8xf32>
      %120 = arith.truncf %119 : vector<16x8xf32> to vector<16x8xbf16>
      %c0_54 = arith.constant 0 : index
      %c8 = arith.constant 8 : index
      %121 = vector.load %arg18[%c0_54, %c8] : memref<16x32xbf16, #tpu.memory_space<vmem>>, vector<16x8xbf16>
      tpu.vector_store %arg18[%c0_54, %c8], %120 {strides = array<i32>} : memref<16x32xbf16, #tpu.memory_space<vmem>>, vector<16x8xbf16>,
      %122 = vector.extract_strided_slice %73 {offsets = [0, 16], sizes = [16, 8], strides = [1, 1]} : vector<16x32xbf16> to vector<16x8xbf16>
      %123 = vector.shape_cast %122 : vector<16x8xbf16> to vector<2x8x8xbf16>
      %124 = vector.extract_strided_slice %75 {offsets = [0, 16], sizes = [16, 8], strides = [1, 1]} : vector<16x32xbf16> to vector<16x8xbf16>
      %125 = vector.shape_cast %124 : vector<16x8xbf16> to vector<2x8x8xbf16>
      %126 = vector.extract_strided_slice %77 {offsets = [0, 16], sizes = [16, 8], strides = [1, 1]} : vector<16x32xbf16> to vector<16x8xbf16>
      %127 = vector.shape_cast %126 : vector<16x8xbf16> to vector<2x8x8xbf16>
      "tpu.trace_start"() <{level = 10 : i32, message = "bqd,bkd->bqk"}> : () -> ()
      %cst_55 = arith.constant dense<0.000000e+00> : vector<2x8x8xf32>
      %128 = tpu.matmul %123, %125, %cst_55 {dimension_numbers = #tpu.dot_dimension_numbers<[2], [2], [1], [1], [0, 0, 0, 1, 1, 1], [0], [0]>} : vector<2x8x8xbf16>, vector<2x8x8xbf16>, vector<2x8x8xf32> -> vector<2x8x8xf32>
      "tpu.trace_stop"() : () -> ()
      %cst_56 = arith.constant dense<0xFF800000> : vector<2x8xf32>
      %129 = vector.multi_reduction <maximumf>, %128, %cst_56 [2] : vector<2x8x8xf32> to vector<2x8xf32>
      %130 = vector.shape_cast %129 : vector<2x8xf32> to vector<2x8x1xf32>
      %131 = vector.broadcast %130 : vector<2x8x1xf32> to vector<2x8x8xf32>
      %132 = arith.subf %128, %131 : vector<2x8x8xf32>
      %133 = math.exp %132 : vector<2x8x8xf32>
      %cst_57 = arith.constant dense<0.000000e+00> : vector<2x8xf32>
      %134 = vector.multi_reduction <add>, %133, %cst_57 [2] : vector<2x8x8xf32> to vector<2x8xf32>
      %135 = vector.shape_cast %134 : vector<2x8xf32> to vector<2x8x1xf32>
      %136 = tpu.reciprocal %135 : vector<2x8x1xf32> -> vector<2x8x1xf32>
      %137 = vector.broadcast %136 : vector<2x8x1xf32> to vector<2x8x8xf32>
      %138 = arith.mulf %133, %137 : vector<2x8x8xf32>
      %139 = arith.truncf %138 : vector<2x8x8xf32> to vector<2x8x8xbf16>
      "tpu.trace_start"() <{level = 10 : i32, message = "bqk,bkd->bqd"}> : () -> ()
      %cst_58 = arith.constant dense<0.000000e+00> : vector<2x8x8xf32>
      %140 = tpu.matmul %139, %127, %cst_58 {dimension_numbers = #tpu.dot_dimension_numbers<[2], [1], [1], [2], [0, 0, 0, 1, 1, 2], [0], [0]>} : vector<2x8x8xbf16>, vector<2x8x8xbf16>, vector<2x8x8xf32> -> vector<2x8x8xf32>
      "tpu.trace_stop"() : () -> ()
      %141 = vector.shape_cast %140 : vector<2x8x8xf32> to vector<16x8xf32>
      %142 = arith.truncf %141 : vector<16x8xf32> to vector<16x8xbf16>
      %c0_59 = arith.constant 0 : index
      %c16 = arith.constant 16 : index
      %143 = vector.load %arg18[%c0_59, %c16] : memref<16x32xbf16, #tpu.memory_space<vmem>>, vector<16x8xbf16>
      tpu.vector_store %arg18[%c0_59, %c16], %142 {strides = array<i32>} : memref<16x32xbf16, #tpu.memory_space<vmem>>, vector<16x8xbf16>,
      %144 = vector.extract_strided_slice %73 {offsets = [0, 24], sizes = [16, 8], strides = [1, 1]} : vector<16x32xbf16> to vector<16x8xbf16>
      %145 = vector.shape_cast %144 : vector<16x8xbf16> to vector<2x8x8xbf16>
      %146 = vector.extract_strided_slice %75 {offsets = [0, 24], sizes = [16, 8], strides = [1, 1]} : vector<16x32xbf16> to vector<16x8xbf16>
      %147 = vector.shape_cast %146 : vector<16x8xbf16> to vector<2x8x8xbf16>
      %148 = vector.extract_strided_slice %77 {offsets = [0, 24], sizes = [16, 8], strides = [1, 1]} : vector<16x32xbf16> to vector<16x8xbf16>
      %149 = vector.shape_cast %148 : vector<16x8xbf16> to vector<2x8x8xbf16>
      "tpu.trace_start"() <{level = 10 : i32, message = "bqd,bkd->bqk"}> : () -> ()
      %cst_60 = arith.constant dense<0.000000e+00> : vector<2x8x8xf32>
      %150 = tpu.matmul %145, %147, %cst_60 {dimension_numbers = #tpu.dot_dimension_numbers<[2], [2], [1], [1], [0, 0, 0, 1, 1, 1], [0], [0]>} : vector<2x8x8xbf16>, vector<2x8x8xbf16>, vector<2x8x8xf32> -> vector<2x8x8xf32>
      "tpu.trace_stop"() : () -> ()
      %cst_61 = arith.constant dense<0xFF800000> : vector<2x8xf32>
      %151 = vector.multi_reduction <maximumf>, %150, %cst_61 [2] : vector<2x8x8xf32> to vector<2x8xf32>
      %152 = vector.shape_cast %151 : vector<2x8xf32> to vector<2x8x1xf32>
      %153 = vector.broadcast %152 : vector<2x8x1xf32> to vector<2x8x8xf32>
      %154 = arith.subf %150, %153 : vector<2x8x8xf32>
      %155 = math.exp %154 : vector<2x8x8xf32>
      %cst_62 = arith.constant dense<0.000000e+00> : vector<2x8xf32>
      %156 = vector.multi_reduction <add>, %155, %cst_62 [2] : vector<2x8x8xf32> to vector<2x8xf32>
      %157 = vector.shape_cast %156 : vector<2x8xf32> to vector<2x8x1xf32>
      %158 = tpu.reciprocal %157 : vector<2x8x1xf32> -> vector<2x8x1xf32>
      %159 = vector.broadcast %158 : vector<2x8x1xf32> to vector<2x8x8xf32>
      %160 = arith.mulf %155, %159 : vector<2x8x8xf32>
      %161 = arith.truncf %160 : vector<2x8x8xf32> to vector<2x8x8xbf16>
      "tpu.trace_start"() <{level = 10 : i32, message = "bqk,bkd->bqd"}> : () -> ()
      %cst_63 = arith.constant dense<0.000000e+00> : vector<2x8x8xf32>
      %162 = tpu.matmul %161, %149, %cst_63 {dimension_numbers = #tpu.dot_dimension_numbers<[2], [1], [1], [2], [0, 0, 0, 1, 1, 2], [0], [0]>} : vector<2x8x8xbf16>, vector<2x8x8xbf16>, vector<2x8x8xf32> -> vector<2x8x8xf32>
      "tpu.trace_stop"() : () -> ()
      %163 = vector.shape_cast %162 : vector<2x8x8xf32> to vector<16x8xf32>
      %164 = arith.truncf %163 : vector<16x8xf32> to vector<16x8xbf16>
      %c0_64 = arith.constant 0 : index
      %c24 = arith.constant 24 : index
      %165 = vector.load %arg18[%c0_64, %c24] : memref<16x32xbf16, #tpu.memory_space<vmem>>, vector<16x8xbf16>
      tpu.vector_store %arg18[%c0_64, %c24], %164 {strides = array<i32>} : memref<16x32xbf16, #tpu.memory_space<vmem>>, vector<16x8xbf16>,
      %c0_65 = arith.constant 0 : index
      %c0_66 = arith.constant 0 : index
      %166 = vector.load %arg18[%c0_65, %c0_66] : memref<16x32xbf16, #tpu.memory_space<vmem>>, vector<16x32xbf16>
      %c0_67 = arith.constant 0 : index
      %c0_68 = arith.constant 0 : index
      %c0_69 = arith.constant 0 : index
      %167 = vector.load %arg8[%c0_67, %c0_68, %c0_69] : memref<1x32x32xbf16, #tpu.memory_space<vmem>>, vector<1x32x32xbf16>
      %168 = vector.shape_cast %167 : vector<1x32x32xbf16> to vector<32x32xbf16>
      %cst_70 = arith.constant dense<0.000000e+00> : vector<16x32xf32>
      %169 = tpu.matmul %166, %168, %cst_70 {dimension_numbers = #tpu.dot_dimension_numbers<[1], [0], [0], [1], [0, 0, 1, 1], [], []>} : vector<16x32xbf16>, vector<32x32xbf16>, vector<16x32xf32> -> vector<16x32xf32>
      %c0_71 = arith.constant 0 : index
      %c0_72 = arith.constant 0 : index
      %c0_73 = arith.constant 0 : index
      %170 = vector.load %arg9[%c0_71, %c0_72, %c0_73] : memref<1x1x32xf32, #tpu.memory_space<vmem>>, vector<1x1x32xf32>
      %171 = vector.shape_cast %170 : vector<1x1x32xf32> to vector<1x32xf32>
      %172 = vector.broadcast %171 : vector<1x32xf32> to vector<16x32xf32>
      %173 = arith.addf %169, %172 : vector<16x32xf32>
      %174 = arith.addf %35, %173 : vector<16x32xf32>
      %c0_74 = arith.constant 0 : index
      %c0_75 = arith.constant 0 : index
      %c0_76 = arith.constant 0 : index
      %175 = vector.load %arg10[%c0_74, %c0_75, %c0_76] : memref<1x1x32xf32, #tpu.memory_space<vmem>>, vector<1x1x32xf32>
      %176 = vector.shape_cast %175 : vector<1x1x32xf32> to vector<1x32xf32>
      %c0_77 = arith.constant 0 : index
      %c0_78 = arith.constant 0 : index
      %c0_79 = arith.constant 0 : index
      %177 = vector.load %arg11[%c0_77, %c0_78, %c0_79] : memref<1x1x32xf32, #tpu.memory_space<vmem>>, vector<1x1x32xf32>
      %178 = vector.shape_cast %177 : vector<1x1x32xf32> to vector<1x32xf32>
      %cst_80 = arith.constant dense<0.000000e+00> : vector<16xf32>
      %179 = vector.multi_reduction <add>, %174, %cst_80 [1] : vector<16x32xf32> to vector<16xf32>
      %180 = vector.shape_cast %179 : vector<16xf32> to vector<16x1xf32>
      %cst_81 = arith.constant 3.200000e+01 : f32
      %181 = vector.broadcast %cst_81 : f32 to vector<16x1xf32>
      %182 = arith.divf %180, %181 : vector<16x1xf32>
      %183 = vector.broadcast %182 : vector<16x1xf32> to vector<16x32xf32>
      %184 = arith.subf %174, %183 : vector<16x32xf32>
      %185 = arith.mulf %184, %184 : vector<16x32xf32>
      %cst_82 = arith.constant dense<0.000000e+00> : vector<16xf32>
      %186 = vector.multi_reduction <add>, %185, %cst_82 [1] : vector<16x32xf32> to vector<16xf32>
      %187 = vector.shape_cast %186 : vector<16xf32> to vector<16x1xf32>
      %cst_83 = arith.constant 3.200000e+01 : f32
      %188 = vector.broadcast %cst_83 : f32 to vector<16x1xf32>
      %189 = arith.divf %187, %188 : vector<16x1xf32>
      %190 = vector.broadcast %182 : vector<16x1xf32> to vector<16x32xf32>
      %191 = arith.subf %174, %190 : vector<16x32xf32>
      %cst_84 = arith.constant 9.99999974E-6 : f32
      %192 = vector.broadcast %cst_84 : f32 to vector<16x1xf32>
      %193 = arith.addf %189, %192 : vector<16x1xf32>
      %194 = math.rsqrt %193 : vector<16x1xf32>
      %195 = vector.broadcast %194 : vector<16x1xf32> to vector<16x32xf32>
      %196 = arith.mulf %191, %195 : vector<16x32xf32>
      %197 = vector.broadcast %176 : vector<1x32xf32> to vector<16x32xf32>
      %198 = arith.mulf %196, %197 : vector<16x32xf32>
      %199 = vector.broadcast %178 : vector<1x32xf32> to vector<16x32xf32>
      %200 = arith.addf %198, %199 : vector<16x32xf32>
      %201 = arith.truncf %200 : vector<16x32xf32> to vector<16x32xbf16>
      %c0_85 = arith.constant 0 : index
      %c0_86 = arith.constant 0 : index
      %202 = vector.load %arg19[%c0_85, %c0_86] : memref<16x32xbf16, #tpu.memory_space<vmem>>, vector<16x32xbf16>
      tpu.vector_store %arg19[%c0_85, %c0_86], %201 {strides = array<i32>} : memref<16x32xbf16, #tpu.memory_space<vmem>>, vector<16x32xbf16>,
      %c0_87 = arith.constant 0 : index
      %c0_88 = arith.constant 0 : index
      %c0_89 = arith.constant 0 : index
      %203 = vector.load %arg15[%c0_87, %c0_88, %c0_89] : memref<1x1x32xf32, #tpu.memory_space<vmem>>, vector<1x1x32xf32>
      %204 = vector.shape_cast %203 : vector<1x1x32xf32> to vector<1x32xf32>
      %205 = vector.broadcast %204 : vector<1x32xf32> to vector<16x32xf32>
      %206 = arith.addf %174, %205 : vector<16x32xf32>
      %c0_90 = arith.constant 0 : index
      %c0_91 = arith.constant 0 : index
      %207 = vector.load %arg17[%c0_90, %c0_91] : memref<16x32xf32, #tpu.memory_space<vmem>>, vector<16x32xf32>
      tpu.vector_store %arg17[%c0_90, %c0_91], %206 {strides = array<i32>} : memref<16x32xf32, #tpu.memory_space<vmem>>, vector<16x32xf32>,
    } else {
    }
    %c0 = arith.constant 0 : index
    %c0_4 = arith.constant 0 : index
    %8 = vector.load %arg19[%c0, %c0_4] : memref<16x32xbf16, #tpu.memory_space<vmem>>, vector<16x32xbf16>
    %c0_5 = arith.constant 0 : index
    %c0_6 = arith.constant 0 : index
    %c0_7 = arith.constant 0 : index
    %9 = vector.load %arg12[%c0_5, %c0_6, %c0_7] : memref<1x32x128xbf16, #tpu.memory_space<vmem>>, vector<1x32x128xbf16>
    %10 = vector.shape_cast %9 : vector<1x32x128xbf16> to vector<32x128xbf16>
    %cst = arith.constant dense<0.000000e+00> : vector<16x128xf32>
    %11 = tpu.matmul %8, %10, %cst {dimension_numbers = #tpu.dot_dimension_numbers<[1], [0], [0], [1], [0, 0, 1, 1], [], []>} : vector<16x32xbf16>, vector<32x128xbf16>, vector<16x128xf32> -> vector<16x128xf32>
    %c0_8 = arith.constant 0 : index
    %c0_9 = arith.constant 0 : index
    %c0_10 = arith.constant 0 : index
    %12 = vector.load %arg13[%c0_8, %c0_9, %c0_10] : memref<1x1x128xf32, #tpu.memory_space<vmem>>, vector<1x1x128xf32>
    %13 = vector.shape_cast %12 : vector<1x1x128xf32> to vector<1x128xf32>
    %14 = vector.broadcast %13 : vector<1x128xf32> to vector<16x128xf32>
    %15 = arith.addf %11, %14 : vector<16x128xf32>
    %cst_11 = arith.constant -1.702000e+00 : f32
    %16 = vector.broadcast %cst_11 : f32 to vector<16x128xf32>
    %17 = arith.mulf %16, %15 : vector<16x128xf32>
    %18 = math.exp %17 : vector<16x128xf32>
    %cst_12 = arith.constant 1.000000e+00 : f32
    %19 = vector.broadcast %cst_12 : f32 to vector<16x128xf32>
    %20 = arith.addf %19, %18 : vector<16x128xf32>
    %21 = tpu.reciprocal %20 {approx = true} : vector<16x128xf32> -> vector<16x128xf32>
    %22 = arith.mulf %15, %21 : vector<16x128xf32>
    %c0_13 = arith.constant 0 : index
    %c0_14 = arith.constant 0 : index
    %23 = vector.load %arg17[%c0_13, %c0_14] : memref<16x32xf32, #tpu.memory_space<vmem>>, vector<16x32xf32>
    %24 = arith.truncf %22 : vector<16x128xf32> to vector<16x128xbf16>
    %c0_15 = arith.constant 0 : index
    %c0_16 = arith.constant 0 : index
    %c0_17 = arith.constant 0 : index
    %25 = vector.load %arg14[%c0_15, %c0_16, %c0_17] : memref<1x128x32xbf16, #tpu.memory_space<vmem>>, vector<1x128x32xbf16>
    %26 = vector.shape_cast %25 : vector<1x128x32xbf16> to vector<128x32xbf16>
    %cst_18 = arith.constant dense<0.000000e+00> : vector<16x32xf32>
    %27 = tpu.matmul %24, %26, %cst_18 {dimension_numbers = #tpu.dot_dimension_numbers<[1], [0], [0], [1], [0, 0, 1, 1], [], []>} : vector<16x128xbf16>, vector<128x32xbf16>, vector<16x32xf32> -> vector<16x32xf32>
    %28 = arith.addf %23, %27 : vector<16x32xf32>
    %c0_19 = arith.constant 0 : index
    %c0_20 = arith.constant 0 : index
    %29 = vector.load %arg17[%c0_19, %c0_20] : memref<16x32xf32, #tpu.memory_space<vmem>>, vector<16x32xf32>
    tpu.vector_store %arg17[%c0_19, %c0_20], %28 {strides = array<i32>} : memref<16x32xf32, #tpu.memory_space<vmem>>, vector<16x32xf32>,
    %c1_i32 = arith.constant 1 : i32
    %30 = arith.cmpi eq, %arg1, %c1_i32 : i32
    %c0_i32_21 = arith.constant 0 : i32
    %31 = arith.cmpi eq, %arg2, %c0_i32_21 : i32
    %32 = arith.andi %30, %31 : i1
    %33 = arith.extui %32 : i1 to i32
    %c0_i32_22 = arith.constant 0 : i32
    %34 = arith.cmpi ne, %33, %c0_i32_22 : i32
    scf.if %34 {
      %c0_23 = arith.constant 0 : index
      %c0_24 = arith.constant 0 : index
      %35 = vector.load %arg17[%c0_23, %c0_24] : memref<16x32xf32, #tpu.memory_space<vmem>>, vector<16x32xf32>
      %36 = vector.shape_cast %35 : vector<16x32xf32> to vector<2x8x32xf32>
      %c0_25 = arith.constant 0 : index
      %c0_26 = arith.constant 0 : index
      %c0_27 = arith.constant 0 : index
      %37 = vector.load %arg16[%c0_25, %c0_26, %c0_27] : memref<2x8x32xf32, #tpu.memory_space<vmem>>, vector<2x8x32xf32>
      tpu.vector_store %arg16[%c0_25, %c0_26, %c0_27], %36 {strides = array<i32>} : memref<2x8x32xf32, #tpu.memory_space<vmem>>, vector<2x8x32xf32>,
    } else {
    }
    return
  }
  func.func @transform_0(%arg0: i32, %arg1: i32, %arg2: i32) -> (i32, i32, i32) {
    %c0_i32 = arith.constant 0 : i32
    %c0_i32_0 = arith.constant 0 : i32
    %c0_i32_1 = arith.constant 0 : i32
    return %arg0, %c0_i32, %c0_i32_0 : i32, i32, i32
  }
  func.func @transform_1(%arg0: i32, %arg1: i32, %arg2: i32) -> (i32, i32, i32) {
    %c0_i32 = arith.constant 0 : i32
    %c0_i32_0 = arith.constant 0 : i32
    %c0_i32_1 = arith.constant 0 : i32
    return %arg1, %c0_i32, %c0_i32_0 : i32, i32, i32
  }
  func.func @transform_2(%arg0: i32, %arg1: i32, %arg2: i32) -> (i32, i32, i32) {
    %c0_i32 = arith.constant 0 : i32
    %c0_i32_0 = arith.constant 0 : i32
    %c0_i32_1 = arith.constant 0 : i32
    return %arg1, %c0_i32, %c0_i32_0 : i32, i32, i32
  }
  func.func @transform_3(%arg0: i32, %arg1: i32, %arg2: i32) -> (i32, i32, i32) {
    %c0_i32 = arith.constant 0 : i32
    %c0_i32_0 = arith.constant 0 : i32
    %c0_i32_1 = arith.constant 0 : i32
    return %arg1, %c0_i32, %c0_i32_0 : i32, i32, i32
  }
  func.func @transform_4(%arg0: i32, %arg1: i32, %arg2: i32) -> (i32, i32, i32) {
    %c0_i32 = arith.constant 0 : i32
    %c0_i32_0 = arith.constant 0 : i32
    %c0_i32_1 = arith.constant 0 : i32
    return %arg1, %c0_i32, %c0_i32_0 : i32, i32, i32
  }
  func.func @transform_5(%arg0: i32, %arg1: i32, %arg2: i32) -> (i32, i32, i32) {
    %c0_i32 = arith.constant 0 : i32
    %c0_i32_0 = arith.constant 0 : i32
    %c0_i32_1 = arith.constant 0 : i32
    return %arg1, %c0_i32, %c0_i32_0 : i32, i32, i32
  }
  func.func @transform_6(%arg0: i32, %arg1: i32, %arg2: i32) -> (i32, i32, i32) {
    %c0_i32 = arith.constant 0 : i32
    %c0_i32_0 = arith.constant 0 : i32
    %c0_i32_1 = arith.constant 0 : i32
    return %arg1, %c0_i32, %c0_i32_0 : i32, i32, i32
  }
  func.func @transform_7(%arg0: i32, %arg1: i32, %arg2: i32) -> (i32, i32, i32) {
    %c0_i32 = arith.constant 0 : i32
    %c0_i32_0 = arith.constant 0 : i32
    %c0_i32_1 = arith.constant 0 : i32
    return %arg1, %c0_i32, %c0_i32_0 : i32, i32, i32
  }
  func.func @transform_8(%arg0: i32, %arg1: i32, %arg2: i32) -> (i32, i32, i32) {
    %c0_i32 = arith.constant 0 : i32
    %c0_i32_0 = arith.constant 0 : i32
    %c0_i32_1 = arith.constant 0 : i32
    return %arg1, %c0_i32, %c0_i32_0 : i32, i32, i32
  }
  func.func @transform_9(%arg0: i32, %arg1: i32, %arg2: i32) -> (i32, i32, i32) {
    %c0_i32 = arith.constant 0 : i32
    %c0_i32_0 = arith.constant 0 : i32
    return %arg1, %c0_i32, %arg2 : i32, i32, i32
  }
  func.func @transform_10(%arg0: i32, %arg1: i32, %arg2: i32) -> (i32, i32, i32) {
    %c0_i32 = arith.constant 0 : i32
    %c0_i32_0 = arith.constant 0 : i32
    return %arg1, %c0_i32, %arg2 : i32, i32, i32
  }
  func.func @transform_11(%arg0: i32, %arg1: i32, %arg2: i32) -> (i32, i32, i32) {
    %c0_i32 = arith.constant 0 : i32
    %c0_i32_0 = arith.constant 0 : i32
    return %arg1, %arg2, %c0_i32 : i32, i32, i32
  }
  func.func @transform_12(%arg0: i32, %arg1: i32, %arg2: i32) -> (i32, i32, i32) {
    %c0_i32 = arith.constant 0 : i32
    %c0_i32_0 = arith.constant 0 : i32
    %c0_i32_1 = arith.constant 0 : i32
    return %arg1, %c0_i32, %c0_i32_0 : i32, i32, i32
  }
  func.func @transform_13(%arg0: i32, %arg1: i32, %arg2: i32) -> (i32, i32, i32) {
    %c0_i32 = arith.constant 0 : i32
    %c0_i32_0 = arith.constant 0 : i32
    %c0_i32_1 = arith.constant 0 : i32
    return %arg0, %c0_i32, %c0_i32_0 : i32, i32, i32
  }
}

</mosaic_0001>

<bundles_post_ra>
// kernel: tpu_custom_call.1
= control target key start
LH: loop header
LB: loop body
LE: loop exit
PB: predicated region body
PF: predicated region fallthrough
CT: control target
= control target key end

     0   :  { %s4460_s0 = inlined_call_operand.hbm [shape: f32[2,8,32], index: 0, kind: input, shape index: {}]   ;;  %s4461_s1 = inlined_call_operand.hbm [shape: f32[2,1,32], index: 1, kind: input, shape index: {}]   ;;  %s4462_s2 = inlined_call_operand.hbm [shape: f32[2,1,32], index: 2, kind: input, shape index: {}]   ;;  %s4463_s3 = inlined_call_operand.hbm [shape: bf16[2,32,96], index: 3, kind: input, shape index: {}]   ;;  %s4464_s4 = inlined_call_operand.hbm [shape: f32[2,1,96], index: 4, kind: input, shape index: {}]   ;;  %s4465_s5 = inlined_call_operand.hbm [shape: bf16[2,32,32], index: 5, kind: input, shape index: {}]   ;;  %s4466_s6 = inlined_call_operand.hbm [shape: f32[2,1,32], index: 6, kind: input, shape index: {}]   ;;  %s4467_s7 = inlined_call_operand.hbm [shape: f32[2,1,32], index: 7, kind: input, shape index: {}]   ;;  %s4468_s8 = inlined_call_operand.hbm [shape: f32[2,1,32], index: 8, kind: input, shape index: {}]   ;;  %s4469_s9 = inlined_call_operand.hbm [shape: bf16[2,32,128], index: 9, kind: input, shape index: {}]   ;;  %s4470_s10 = inlined_call_operand.hbm [shape: f32[2,1,128], index: 10, kind: input, shape index: {}]   ;;  %s4471_s11 = inlined_call_operand.hbm [shape: bf16[2,128,32], index: 11, kind: input, shape index: {}]   ;;  %s4472_s12 = inlined_call_operand.hbm [shape: f32[2,1,32], index: 12, kind: input, shape index: {}]   ;;  %s4473_s13 = inlined_call_operand.hbm [shape: f32[2,8,32], index: 13, kind: output, shape index: {}]  }
   0x1   :  { %4495 = sst [smem:[#allocation39_spill]] %s4460_s0 }
   0x2   :  { %4496 = sst [smem:[#allocation40_spill]] %s4461_s1 }
   0x3   :  { %4497 = sst [smem:[#allocation41_spill]] %s4463_s3 }
   0x4   :  { %4498 = sst [smem:[#allocation42_spill]] %s4465_s5 }
   0x5   :  { %4499 = sst [smem:[#allocation43_spill]] %s4467_s7 }
   0x6   :  { %4500 = sst [smem:[#allocation44_spill]] %s4468_s8 }
   0x7   :  { %4501 = sst [smem:[#allocation45_spill]] %s4470_s10 }
   0x8   :  { %4502 = sst [smem:[#allocation46_spill]] %s4472_s12 }
   0x9   :  { %4503 = sst [smem:[#allocation47_spill]] %s4473_s13 }
   0xa   :  { %18 = vsyncpa [#allocation6], 0 }
   0xb   :  { %19 = vsyncpa [#allocation9], 0 }
   0xc   :  { %21 = vsyncpa [#allocation9 + $0x1], 0 }
   0xd   :  { %22 = vsyncpa [#allocation12], 0 }
   0xe   :  { %24 = vsyncpa [#allocation12 + $0x1], 0 }
   0xf   :  { %25 = vsyncpa [#allocation15], 0 }
  0x10   :  { %27 = vsyncpa [#allocation15 + $0x1], 0 }
  0x11   :  { %28 = vsyncpa [#allocation18], 0 }
  0x12   :  { %30 = vsyncpa [#allocation18 + $0x1], 0 }
  0x13   :  { %31 = vsyncpa [#allocation21], 0 }
  0x14   :  { %33 = vsyncpa [#allocation21 + $0x1], 0 }
  0x15   :  { %34 = vsyncpa [#allocation24], 0 }
  0x16   :  { %36 = vsyncpa [#allocation24 + $0x1], 0 }
  0x17   :  { %37 = vsyncpa [#allocation7], 0  ;;  %s3654_s25 = smov 0   ;;  %s3656_s26 = smov 0  }
  0x18   :  { %s3658_s27 = smov 0   ;;  %s3660_s28 = smov 0  }
  0x19   :  { %s3662_s29 = smov 0   ;;  %s3664_s30 = smov 0  }
  0x1a LB: > { %4504 = sst [smem:[#allocation35_spill]] %s3535_s27  ;;  %s58_s14 = sadd.s32 1, %s3543_s29  ;;  %s3547_s30 = sphi %s3664_s30, %s43_s30   ;;  %s3543_s29 = sphi %s3662_s29, %s4553_s29   ;;  %s3539_s28 = sphi %s3660_s28, %s4552_s28   ;;  %s3535_s27 = sphi %s3658_s27, %s4548_s27   ;;  %s3531_s26 = sphi %s3656_s26, %s4551_s26   ;;  %s3527_s25 = sphi %s3654_s25, %s4550_s25  }
  0x1b   : > { %4505 = sst [smem:[#allocation36_spill]] %s3539_s28  ;;  %s95_s15 = sadd.s32 1, %s3535_s27 }
  0x1c   : > { %p60_p0 = scmp.ge.s32.totalorder %s58_s14, 2  ;;  %p102_p1 = scmp.ne.s32.totalorder %s3535_s27, %s3531_s26 }
  0x1d   : > { %p103_p2 = scmp.eq.s32.totalorder %s3547_s30, 0  ;;  %p2918_p4 = scmp.lt.s32.totalorder %s3547_s30, 2 }
  0x1e   : > { %s4555_s14 = smov (%p60_p0, %s58_s14), 0  ;;  %s3695_s17 = sand.u32 1, %s3547_s30  }
  0x1f   : > { %4506 = sst [smem:[#allocation37_spill]] %s4555_s14  ;;  %p104_p3 = por %p103_p2, %p102_p1 }
  0x20   : > { %s92_s16 = ssub.s32 %s3543_s29, %s4555_s14  ;;  %s3698_s18 = sand.u32 1, %s3535_s27  }
  0x21   : > { %p93_p5 = scmp.eq.s32.totalorder %s92_s16, 0  ;;  %s3701_s19 = sshll.u32 %s3543_s29, 4 }
  0x22   : > { %s4508_s1 = sld [smem:[#allocation40_spill]]  ;;  %s469_s24 = scalar_lea.vmem [#allocation8], %s3698_s18 }
  0x23   : > { %s3704_s20 = scalar_select %p93_p5, %s3535_s27, %s95_s15  }
  0x24   : > { %s476_s16 = sshll.u32 %s469_s24, 4  ;;  %p3713_p6 = pnand %p2918_p4, %p104_p3  ;;  %s3717_s16 = int_to_ptr.vmem [resolvable:$true] %s476_s16 }
  0x25   : > { %4507 = sst [smem:[#allocation38_spill]] %s3704_s20  ;;  %s3720_s15 = sshll.u32 %s3698_s18, 4 }
  0x26   : > { %s4509_s14 = scalar_select %p3713_p6, 1, 0 }
  0x27   : > { %p3727_p8 = pneg %p3713_p6 }
  0x28   : > { %s3710_s23 = scalar_lea.hbm %s4508_s1, %s3701_s19  ;;  %s3060_s13 = scalar_lea.hbm %s4508_s1, 32 }
  0x29   : > { %s3055_s27 = scalar_lea.hbm %s3710_s23, 16  ;;  %p3061_p11 = scmp.lt.u32.totalorder %s3710_s23, %s4508_s1 }
  0x2a   : > { %p3056_p7 = scmp.ne.s32.totalorder %s3710_s23, %s3055_s27  ;;  %p3062_p12 = scmp.lt.u32.totalorder %s3060_s13, %s3055_s27 }
  0x2b   : > { %s4510_s21 = scalar_select %p3727_p8, 1, 0 }
  0x2c   : > { %p3058_p9 = pnand %p3727_p8, %p3056_p7  ;;  %p3063_p13 = por %p3062_p12, %p3061_p11 }
  0x2d   : > { %p3064_p0 = scmp.lt.u32.totalorder %s3055_s27, %s3710_s23 }
  0x2e   : > { %p3059_p10 = pneg %p3058_p9 }
  0x2f   : > { %p3065_p1 = por %p3064_p0, %p3063_p13 }
  0x31   : > { %p3066_p2 = pnand %p3065_p1, %p3059_p10 }
  0x33   : > { %3069 = shalt.err (!%p3066_p2)
}
  0x34   : > { %s3070_s20 = scalar_lea.vmem %s3717_s16, 16  ;;  %s3549_s22 = smov [#allocation8]  }
  0x35   : > { %p3071_p3 = scmp.ne.s32.totalorder %s3717_s16, %s3070_s20  ;;  %s3075_s24 = sshll.u32 %s3549_s22, 4  ;;  %s3076_s24 = int_to_ptr.vmem [resolvable:$false] %s3075_s24 }
  0x36   : > { %s3077_s12 = scalar_lea.vmem %s3076_s24, 32  ;;  %p3078_p7 = scmp.lt.s32.totalorder %s3717_s16, %s3076_s24 }
  0x37   : > { %p3073_p4 = pnand %p3071_p3, %p3727_p8  ;;  %p3079_p9 = scmp.lt.s32.totalorder %s3077_s12, %s3070_s20 }
  0x39   : > { %p3074_p5 = pneg %p3073_p4  ;;  %p3080_p11 = por %p3079_p9, %p3078_p7 }
  0x3b   : > { %p3081_p12 = pnand %p3080_p11, %p3074_p5 }
  0x3d   : > { %3084 = shalt.err (!%p3081_p12)
}
  0x3e   : > { %s4511_s13 = scalar_lea.sflag [#allocation9], %s3695_s17  ;;  %s3753_s27 = sshll.u32 %s3543_s29, 8 }
  0x3f   : > { %2883 = dma.hbm_to_vmem [thread:$0]  (!%p3713_p6), %s3710_s23, 16, %s3717_s16, %s4511_s13  }
  0x40   : > { %s4512_s3 = sld [smem:[#allocation41_spill]]  ;;  %s504_s24 = scalar_lea.vmem [#allocation11], %s3720_s15 }
  0x41   : > { %s511_s12 = sshll.u32 %s504_s24, 4  ;;  %s4480_s1 = scalar_lea.sflag [#allocation12], %s3695_s17  ;;  %s3762_s12 = int_to_ptr.vmem [resolvable:$true] %s511_s12 }
  0x46   : > { %s3759_s20 = scalar_lea.hbm %s4512_s3, %s3753_s27  ;;  %s3090_s13 = scalar_lea.hbm %s4512_s3, 512 }
  0x47   : > { %s3085_s10 = scalar_lea.hbm %s3759_s20, 256  ;;  %p3091_p1 = scmp.lt.u32.totalorder %s3759_s20, %s4512_s3 }
  0x48   : > { %p3086_p10 = scmp.ne.s32.totalorder %s3759_s20, %s3085_s10  ;;  %p3092_p2 = scmp.lt.u32.totalorder %s3090_s13, %s3085_s10 }
  0x49   : > { %p3094_p4 = scmp.lt.u32.totalorder %s3085_s10, %s3759_s20 }
  0x4a   : > { %p3088_p13 = pnand %p3086_p10, %p3727_p8  ;;  %p3093_p3 = por %p3092_p2, %p3091_p1 }
  0x4c   : > { %p3089_p0 = pneg %p3088_p13  ;;  %p3095_p5 = por %p3094_p4, %p3093_p3 }
  0x4e   : > { %p3096_p7 = pnand %p3095_p5, %p3089_p0 }
  0x50   : > { %3099 = shalt.err (!%p3096_p7)
}
  0x51   : > { %s3100_s24 = scalar_lea.vmem %s3762_s12, 256  ;;  %s3550_s23 = smov [#allocation11]  }
  0x52   : > { %p3101_p9 = scmp.ne.s32.totalorder %s3762_s12, %s3100_s24  ;;  %s3105_s16 = sshll.u32 %s3550_s23, 4  ;;  %s3106_s16 = int_to_ptr.vmem [resolvable:$false] %s3105_s16 }
  0x53   : > { %s3107_s28 = scalar_lea.vmem %s3106_s16, 512  ;;  %p3108_p10 = scmp.lt.s32.totalorder %s3762_s12, %s3106_s16 }
  0x54   : > { %p3103_p11 = pnand %p3101_p9, %p3727_p8  ;;  %p3109_p13 = scmp.lt.s32.totalorder %s3107_s28, %s3100_s24 }
  0x56   : > { %p3104_p12 = pneg %p3103_p11  ;;  %p3110_p1 = por %p3109_p13, %p3108_p10 }
  0x58   : > { %p3111_p2 = pnand %p3110_p1, %p3104_p12 }
  0x5a   : > { %3114 = shalt.err (!%p3111_p2)
}
  0x5b   : > { %s4482_s10 = smov 64   ;;  %s3552_s13 = smov 4  }
  0x5c   : > { %2889 = dma.hbm_to_vmem [thread:$0]  (!%p3713_p6), %s3759_s20, 256, %s3762_s12, %s4480_s1, %s4482_s10, %s4482_s10, %s3552_s13  }
  0x5d   : > { %s4513_s5 = sld [smem:[#allocation42_spill]]  ;;  %s542_s16 = scalar_lea.vmem [#allocation14], %s3720_s15 }
  0x5e   : > { %s549_s28 = sshll.u32 %s542_s16, 4  ;;  %s4481_s3 = scalar_lea.sflag [#allocation15], %s3695_s17  ;;  %s3798_s28 = int_to_ptr.vmem [resolvable:$true] %s549_s28 }
  0x63   : > { %s3795_s23 = scalar_lea.hbm %s4513_s5, %s3753_s27  ;;  %s3120_s22 = scalar_lea.hbm %s4513_s5, 512 }
  0x64   : > { %s3115_s8 = scalar_lea.hbm %s3795_s23, 256  ;;  %p3121_p5 = scmp.lt.u32.totalorder %s3795_s23, %s4513_s5 }
  0x65   : > { %p3116_p0 = scmp.ne.s32.totalorder %s3795_s23, %s3115_s8  ;;  %p3122_p7 = scmp.lt.u32.totalorder %s3120_s22, %s3115_s8 }
  0x66   : > { %p3124_p11 = scmp.lt.u32.totalorder %s3115_s8, %s3795_s23 }
  0x67   : > { %p3118_p3 = pnand %p3116_p0, %p3727_p8  ;;  %p3123_p9 = por %p3122_p7, %p3121_p5 }
  0x69   : > { %p3119_p4 = pneg %p3118_p3  ;;  %p3125_p12 = por %p3124_p11, %p3123_p9 }
  0x6b   : > { %p3126_p10 = pnand %p3125_p12, %p3119_p4 }
  0x6d   : > { %3129 = shalt.err (!%p3126_p10)
}
  0x6e   : > { %s3130_s16 = scalar_lea.vmem %s3798_s28, 256  ;;  %s3553_s20 = smov [#allocation14]  }
  0x6f   : > { %p3131_p13 = scmp.ne.s32.totalorder %s3798_s28, %s3130_s16  ;;  %s3135_s12 = sshll.u32 %s3553_s20, 4  ;;  %s3136_s12 = int_to_ptr.vmem [resolvable:$false] %s3135_s12 }
  0x70   : > { %s3137_s1 = scalar_lea.vmem %s3136_s12, 512  ;;  %p3138_p0 = scmp.lt.s32.totalorder %s3798_s28, %s3136_s12 }
  0x71   : > { %p3133_p1 = pnand %p3131_p13, %p3727_p8  ;;  %p3139_p3 = scmp.lt.s32.totalorder %s3137_s1, %s3130_s16 }
  0x73   : > { %p3134_p2 = pneg %p3133_p1  ;;  %p3140_p5 = por %p3139_p3, %p3138_p0 }
  0x75   : > { %p3141_p7 = pnand %p3140_p5, %p3134_p2 }
  0x77   : > { %3144 = shalt.err (!%p3141_p7)
}
  0x78   : > { %2895 = dma.hbm_to_vmem [thread:$0]  (!%p3713_p6), %s3795_s23, 256, %s3798_s28, %s4481_s3, %s4482_s10, %s4482_s10, %s3552_s13  }
  0x79   : > { %s4514_s7 = sld [smem:[#allocation43_spill]]  ;;  %s579_s16 = scalar_lea.vmem [#allocation17], %s3698_s18 }
  0x7a   : > { %s586_s20 = sshll.u32 %s579_s16, 4  ;;  %s4494_s12 = scalar_lea.sflag [#allocation18], %s3695_s17  ;;  %s587_s20 = int_to_ptr.vmem [resolvable:$true] %s586_s20 }
  0x7f   : > { %s3831_s24 = scalar_lea.hbm %s4514_s7, %s3701_s19  ;;  %s3150_s28 = scalar_lea.hbm %s4514_s7, 32 }
  0x80   : > { %s3145_s1 = scalar_lea.hbm %s3831_s24, 16  ;;  %p3151_p12 = scmp.lt.u32.totalorder %s3831_s24, %s4514_s7 }
  0x81   : > { %p3146_p4 = scmp.ne.s32.totalorder %s3831_s24, %s3145_s1  ;;  %p3152_p10 = scmp.lt.u32.totalorder %s3150_s28, %s3145_s1 }
  0x82   : > { %p3154_p1 = scmp.lt.u32.totalorder %s3145_s1, %s3831_s24 }
  0x83   : > { %p3148_p9 = pnand %p3146_p4, %p3727_p8  ;;  %p3153_p13 = por %p3152_p10, %p3151_p12 }
  0x85   : > { %p3149_p11 = pneg %p3148_p9  ;;  %p3155_p2 = por %p3154_p1, %p3153_p13 }
  0x87   : > { %p3156_p0 = pnand %p3155_p2, %p3149_p11 }
  0x89   : > { %3159 = shalt.err (!%p3156_p0)
}
  0x8a   : > { %s3160_s16 = scalar_lea.vmem %s587_s20, 16  ;;  %s3554_s3 = smov [#allocation17]  }
  0x8b   : > { %p3161_p3 = scmp.ne.s32.totalorder %s587_s20, %s3160_s16  ;;  %s3165_s10 = sshll.u32 %s3554_s3, 4  ;;  %s3166_s10 = int_to_ptr.vmem [resolvable:$false] %s3165_s10 }
  0x8c   : > { %s3167_s5 = scalar_lea.vmem %s3166_s10, 32  ;;  %p3168_p4 = scmp.lt.s32.totalorder %s587_s20, %s3166_s10 }
  0x8d   : > { %p3163_p5 = pnand %p3161_p3, %p3727_p8  ;;  %p3169_p9 = scmp.lt.s32.totalorder %s3167_s5, %s3160_s16 }
  0x8f   : > { %p3164_p7 = pneg %p3163_p5  ;;  %p3170_p6 = por %p3169_p9, %p3168_p4 }
  0x91   : > { %p3171_p10 = pnand %p3170_p6, %p3164_p7 }
  0x93   : > { %3174 = shalt.err (!%p3171_p10)
}
  0x94   : > { %p4515_p12 = scmp.ne.s32.totalorder %s4509_s14, 0  ;;  %s3858_s23 = scalar_lea.hbm %s4469_s9, %s3753_s27 }
  0x95   : > { %s614_s10 = scalar_lea.vmem [#allocation20], %s3720_s15  ;;  %s2583_s8 = sshll.u32 %s3698_s18, 6 }
  0x96   : > { %2901 = dma.hbm_to_vmem [thread:$0]  (!%p4515_p12), %s3831_s24, 16, %s587_s20, %s4494_s12  }
  0x97   : > { %s622_s28 = sshll.u32 %s614_s10, 4  ;;  %s4487_s22 = scalar_lea.sflag [#allocation21], %s3695_s17  ;;  %s3861_s28 = int_to_ptr.vmem [resolvable:$true] %s622_s28 }
  0x98   : > { %s3175_s16 = scalar_lea.hbm %s3858_s23, 256  ;;  %s3180_s27 = scalar_lea.hbm %s4469_s9, 512 }
  0x99   : > { %p3176_p6 = scmp.ne.s32.totalorder %s3858_s23, %s3175_s16  ;;  %p3181_p1 = scmp.lt.u32.totalorder %s3858_s23, %s4469_s9 }
  0x9a   : > { %p3182_p2 = scmp.lt.u32.totalorder %s3180_s27, %s3175_s16  ;;  %p3184_p3 = scmp.lt.u32.totalorder %s3175_s16, %s3858_s23 }
  0x9b   : > { %p3178_p11 = pnand %p3176_p6, %p3727_p8 }
  0x9c   : > { %p3183_p0 = por %p3182_p2, %p3181_p1 }
  0x9d   : > { %p3179_p13 = pneg %p3178_p11 }
  0x9e   : > { %p3185_p5 = por %p3184_p3, %p3183_p0 }
  0xa0   : > { %p3186_p7 = pnand %p3185_p5, %p3179_p13 }
  0xa2   : > { %3189 = shalt.err (!%p3186_p7)
}
  0xa3   : > { %s3190_s15 = scalar_lea.vmem %s3861_s28, 256  ;;  %s3555_s3 = smov [#allocation20]  }
  0xa4   : > { %p3191_p4 = scmp.ne.s32.totalorder %s3861_s28, %s3190_s15  ;;  %s3195_s10 = sshll.u32 %s3555_s3, 4  ;;  %s3196_s10 = int_to_ptr.vmem [resolvable:$false] %s3195_s10 }
  0xa5   : > { %s3197_s24 = scalar_lea.vmem %s3196_s10, 512  ;;  %p3198_p6 = scmp.lt.s32.totalorder %s3861_s28, %s3196_s10 }
  0xa6   : > { %p3193_p9 = pnand %p3191_p4, %p3727_p8  ;;  %p3199_p11 = scmp.lt.s32.totalorder %s3197_s24, %s3190_s15 }
  0xa8   : > { %p3194_p10 = pneg %p3193_p9  ;;  %p3200_p1 = por %p3199_p11, %p3198_p6 }
  0xaa   : > { %p3201_p2 = pnand %p3200_p1, %p3194_p10 }
  0xac   : > { %3204 = shalt.err (!%p3201_p2)
}
  0xad   : > { %s4516_s16 = smov 64   ;;  %s2647_s20 = sshll.u32 %s3543_s29, 10 }
  0xae   : > { %2907 = dma.hbm_to_vmem [thread:$0]  (!%p4515_p12), %s3858_s23, 256, %s3861_s28, %s4487_s22, %s4516_s16, %s4516_s16, %s3552_s13  }
  0xaf   : > { %s3895_s1 = scalar_lea.hbm %s4471_s11, %s2647_s20  ;;  %s654_s15 = scalar_lea.vmem [#allocation23], %s2583_s8 }
  0xb0   : > { %s663_s3 = sshll.u32 %s654_s15, 4  ;;  %s4486_s10 = scalar_lea.sflag [#allocation24], %s3695_s17  ;;  %s3899_s3 = int_to_ptr.vmem [resolvable:$true] %s663_s3 }
  0xb1   : > { %s3205_s24 = scalar_lea.hbm %s3895_s1, 1024  ;;  %s3210_s20 = scalar_lea.hbm %s4471_s11, 2048 }
  0xb2   : > { %p3206_p13 = scmp.ne.s32.totalorder %s3895_s1, %s3205_s24  ;;  %p3211_p5 = scmp.lt.u32.totalorder %s3895_s1, %s4471_s11 }
  0xb3   : > { %p3212_p7 = scmp.lt.u32.totalorder %s3210_s20, %s3205_s24  ;;  %p3214_p9 = scmp.lt.u32.totalorder %s3205_s24, %s3895_s1 }
  0xb4   : > { %p3208_p0 = pnand %p3206_p13, %p3727_p8 }
  0xb5   : > { %p3213_p4 = por %p3212_p7, %p3211_p5 }
  0xb6   : > { %p3209_p3 = pneg %p3208_p0 }
  0xb7   : > { %p3215_p10 = por %p3214_p9, %p3213_p4 }
  0xb9   : > { %p3216_p6 = pnand %p3215_p10, %p3209_p3 }
  0xbb   : > { %3219 = shalt.err (!%p3216_p6)
}
  0xbc   : > { %s3220_s8 = scalar_lea.vmem %s3899_s3, 1024  ;;  %s3556_s15 = smov [#allocation23]  }
  0xbd   : > { %p3221_p11 = scmp.ne.s32.totalorder %s3899_s3, %s3220_s8  ;;  %s3225_s23 = sshll.u32 %s3556_s15, 4  ;;  %s3226_s23 = int_to_ptr.vmem [resolvable:$false] %s3225_s23 }
  0xbe   : > { %s3227_s28 = scalar_lea.vmem %s3226_s23, 2048  ;;  %p3228_p13 = scmp.lt.s32.totalorder %s3899_s3, %s3226_s23 }
  0xbf   : > { %p3223_p1 = pnand %p3221_p11, %p3727_p8  ;;  %p3229_p0 = scmp.lt.s32.totalorder %s3227_s28, %s3220_s8 }
  0xc1   : > { %p3224_p2 = pneg %p3223_p1  ;;  %p3230_p5 = por %p3229_p0, %p3228_p13 }
  0xc3   : > { %p3231_p7 = pnand %p3230_p5, %p3224_p2 }
  0xc5   : > { %3234 = shalt.err (!%p3231_p7)
}
  0xc6   : > { %2913 = dma.hbm_to_vmem [thread:$0]  (!%p4515_p12), %s3895_s1, 1024, %s3899_s3, %s4486_s10, %s4516_s16, %s4516_s16, %s3552_s13  }
  0xc7   : > { %s3929_s24 = sadd.s32 4294967295, %s3547_s30   ;;  %p108_p3 = scmp.ne.s32.totalorder %s3531_s26, %s3527_s25 }
  0xc8   : > { %p4488_p4 = scmp.eq.s32.totalorder %s3929_s24, 0  ;;  %p2564_p9 = scmp.ge.s32.totalorder %s3547_s30, 1 }
  0xc9   : > { %p437_p10 = scmp.lt.s32.totalorder %s3547_s30, 3  ;;  %s3557_s13 = smov [#allocation5]  }
  0xca   : > { %p3938_p6 = por %p4488_p4, %p108_p3  ;;  %s452_s16 = sshll.u32 %s3557_s13, 4  ;;  %s453_s16 = int_to_ptr.vmem [resolvable:$true] %s452_s16 }
  0xcb   : > { %p3942_p11 = pnand %p2564_p9, %p437_p10  ;;  %s3958_s5 = scalar_lea.hbm %s4462_s2, %s3701_s19 }
  0xcc   : > { %s4517_s20 = scalar_select %p3938_p6, 1, 0 }
  0xcd   : > { %s4518_s27 = scalar_select %p3942_p11, 1, 0 }
  0xce   : > { %p2876_p1 = pneg %p3942_p11  ;;  %s486_s8 = scalar_lea.vmem [#allocation10], %s3698_s18 }
  0xcf   : > { %s493_s15 = sshll.u32 %s486_s8, 4  ;;  %s4520_s0 = sld [smem:[#allocation39_spill]]  ;;  %s3961_s15 = int_to_ptr.vmem [resolvable:$true] %s493_s15 }
  0xd0   : > { %p3950_p2 = pnand %p2876_p1, %p4488_p4 }
  0xd2   : > { %p3237_p0 = pneg %p3950_p2 }
  0xd5   : > { %s3235_s13 = scalar_lea.hbm %s4520_s0, 256 }
  0xd6   : > { %p3236_p13 = scmp.ne.s32.totalorder %s4520_s0, %s3235_s13  ;;  %p3242_p3 = scmp.lt.u32.totalorder %s3235_s13, %s4520_s0 }
  0xd8   : > { %p3238_p5 = pnand %p3237_p0, %p3236_p13 }
  0xda   : > { %p3239_p7 = pneg %p3238_p5 }
  0xdc   : > { %p3244_p9 = pnand %p3242_p3, %p3239_p7 }
  0xde   : > { %3247 = shalt.err (!%p3244_p9)
}
  0xdf   : > { %s3248_s8 = scalar_lea.vmem %s453_s16, 256  ;;  %p3256_p6 = scmp.lt.s32.totalorder %s453_s16, %s453_s16 }
  0xe0   : > { %p3249_p10 = scmp.ne.s32.totalorder %s453_s16, %s3248_s8  ;;  %p3257_p11 = scmp.lt.s32.totalorder %s3248_s8, %s3248_s8 }
  0xe2   : > { %p3251_p1 = pnand %p3249_p10, %p3237_p0  ;;  %p3258_p12 = por %p3257_p11, %p3256_p6 }
  0xe4   : > { %p3252_p4 = pneg %p3251_p1 }
  0xe6   : > { %p3259_p8 = pnand %p3258_p12, %p3252_p4 }
  0xe8   : > { %3262 = shalt.err (!%p3259_p8)
}
  0xe9   : > { %s3558_s22 = smov 128   ;;  %s3559_s10 = smov 8  }
  0xea   : > { %2879 = dma.hbm_to_vmem [thread:$0]  (!%p3950_p2), %s4520_s0, 256, %s453_s16, [#allocation6], %s3558_s22, %s3558_s22, %s3559_s10  }
  0xeb   : > { %s3263_s13 = scalar_lea.hbm %s3958_s5, 16  ;;  %p4521_p0 = scmp.ne.s32.totalorder %s4510_s21, 0 }
  0xec   : > { %p3264_p13 = scmp.ne.s32.totalorder %s3958_s5, %s3263_s13  ;;  %s3268_s8 = scalar_lea.hbm %s4462_s2, 32 }
  0xed   : > { %p3269_p8 = scmp.lt.u32.totalorder %s3958_s5, %s4462_s2  ;;  %p3270_p12 = scmp.lt.u32.totalorder %s3268_s8, %s3263_s13 }
  0xee   : > { %p3266_p5 = pnand %p3264_p13, %p4521_p0  ;;  %p3272_p11 = scmp.lt.u32.totalorder %s3263_s13, %s3958_s5 }
  0xef   : > { %p3271_p4 = por %p3270_p12, %p3269_p8 }
  0xf0   : > { %p3267_p6 = pneg %p3266_p5 }
  0xf1   : > { %p3273_p7 = por %p3272_p11, %p3271_p4 }
  0xf3   : > { %p3274_p3 = pnand %p3273_p7, %p3267_p6 }
  0xf5   : > { %3277 = shalt.err (!%p3274_p3)
}
  0xf6   : > { %s3278_s16 = scalar_lea.vmem %s3961_s15, 16  ;;  %s3560_s25 = smov [#allocation10]  }
  0xf7   : > { %p3279_p2 = scmp.ne.s32.totalorder %s3961_s15, %s3278_s16  ;;  %s3283_s22 = sshll.u32 %s3560_s25, 4  ;;  %s3284_s22 = int_to_ptr.vmem [resolvable:$false] %s3283_s22 }
  0xf8   : > { %s3285_s7 = scalar_lea.vmem %s3284_s22, 32  ;;  %p3286_p1 = scmp.lt.s32.totalorder %s3961_s15, %s3284_s22 }
  0xf9   : > { %p3281_p9 = pnand %p3279_p2, %p4521_p0  ;;  %p3287_p13 = scmp.lt.s32.totalorder %s3285_s7, %s3278_s16 }
  0xfb   : > { %p3282_p10 = pneg %p3281_p9  ;;  %p3288_p5 = por %p3287_p13, %p3286_p1 }
  0xfd   : > { %p3289_p8 = pnand %p3288_p5, %p3282_p10 }
  0xff   : > { %3292 = shalt.err (!%p3289_p8)
}
 0x100   : > { %p4522_p6 = scmp.ne.s32.totalorder %s4509_s14, 0  ;;  %s4523_s12 = scalar_lea.sflag [#allocation9], %s3695_s17 }
 0x101   : > { %s4006_s28 = scalar_lea.hbm %s4464_s4, %s3701_s19  ;;  %s524_s13 = scalar_lea.vmem [#allocation13], %s3698_s18 }
 0x102   : > { %2886 = dma.hbm_to_vmem [thread:$0]  (!%p4522_p6), %s3958_s5, 16, %s3961_s15, %s4523_s12  }
 0x103   : > { %s531_s1 = sshll.u32 %s524_s13, 4  ;;  %s3293_s3 = scalar_lea.hbm %s4006_s28, 16  ;;  %s532_s1 = int_to_ptr.vmem [resolvable:$true] %s531_s1 }
 0x104   : > { %p3294_p12 = scmp.ne.s32.totalorder %s4006_s28, %s3293_s3  ;;  %s3298_s5 = scalar_lea.hbm %s4464_s4, 32 }
 0x105   : > { %p3299_p7 = scmp.lt.u32.totalorder %s4006_s28, %s4464_s4  ;;  %p3300_p3 = scmp.lt.u32.totalorder %s3298_s5, %s3293_s3 }
 0x106   : > { %p3296_p4 = pnand %p3294_p12, %p4521_p0  ;;  %p3302_p9 = scmp.lt.u32.totalorder %s3293_s3, %s4006_s28 }
 0x107   : > { %p3301_p2 = por %p3300_p3, %p3299_p7 }
 0x108   : > { %p3297_p11 = pneg %p3296_p4 }
 0x109   : > { %p3303_p10 = por %p3302_p9, %p3301_p2 }
 0x10b   : > { %p3304_p1 = pnand %p3303_p10, %p3297_p11 }
 0x10d   : > { %3307 = shalt.err (!%p3304_p1)
}
 0x10e   : > { %s3308_s22 = scalar_lea.vmem %s532_s1, 16  ;;  %s3561_s7 = smov [#allocation13]  }
 0x10f   : > { %p3309_p13 = scmp.ne.s32.totalorder %s532_s1, %s3308_s22  ;;  %s3313_s12 = sshll.u32 %s3561_s7, 4  ;;  %s3314_s12 = int_to_ptr.vmem [resolvable:$false] %s3313_s12 }
 0x110   : > { %s3315_s10 = scalar_lea.vmem %s3314_s12, 32  ;;  %p3316_p12 = scmp.lt.s32.totalorder %s532_s1, %s3314_s12 }
 0x111   : > { %p3311_p5 = pnand %p3309_p13, %p4521_p0  ;;  %p3317_p4 = scmp.lt.s32.totalorder %s3315_s10, %s3308_s22 }
 0x113   : > { %p3312_p8 = pneg %p3311_p5  ;;  %p3318_p6 = por %p3317_p4, %p3316_p12 }
 0x115   : > { %p3319_p3 = pnand %p3318_p6, %p3312_p8 }
 0x117   : > { %3322 = shalt.err (!%p3319_p3)
}
 0x118   : > { %p4524_p7 = scmp.ne.s32.totalorder %s4509_s14, 0  ;;  %s4525_s23 = scalar_lea.sflag [#allocation12], %s3695_s17 }
 0x119   : > { %s4032_s8 = scalar_lea.hbm %s4466_s6, %s3701_s19  ;;  %s562_s16 = scalar_lea.vmem [#allocation16], %s3698_s18 }
 0x11a   : > { %2892 = dma.hbm_to_vmem [thread:$0]  (!%p4524_p7), %s4006_s28, 16, %s532_s1, %s4525_s23  }
 0x11b   : > { %s569_s5 = sshll.u32 %s562_s16, 4  ;;  %s3323_s15 = scalar_lea.hbm %s4032_s8, 16  ;;  %s570_s5 = int_to_ptr.vmem [resolvable:$true] %s569_s5 }
 0x11c   : > { %p3324_p6 = scmp.ne.s32.totalorder %s4032_s8, %s3323_s15  ;;  %s3328_s28 = scalar_lea.hbm %s4466_s6, 32 }
 0x11d   : > { %p3329_p9 = scmp.lt.u32.totalorder %s4032_s8, %s4466_s6  ;;  %p3330_p10 = scmp.lt.u32.totalorder %s3328_s28, %s3323_s15 }
 0x11e   : > { %p3326_p11 = pnand %p3324_p6, %p4521_p0  ;;  %p3332_p13 = scmp.lt.u32.totalorder %s3323_s15, %s4032_s8 }
 0x11f   : > { %p3331_p1 = por %p3330_p10, %p3329_p9 }
 0x120   : > { %p3327_p2 = pneg %p3326_p11 }
 0x121   : > { %p3333_p5 = por %p3332_p13, %p3331_p1 }
 0x123   : > { %p3334_p8 = pnand %p3333_p5, %p3327_p2 }
 0x125   : > { %3337 = shalt.err (!%p3334_p8)
}
 0x126   : > { %s3338_s12 = scalar_lea.vmem %s570_s5, 16  ;;  %s3562_s10 = smov [#allocation16]  }
 0x127   : > { %p3339_p12 = scmp.ne.s32.totalorder %s570_s5, %s3338_s12  ;;  %s3343_s23 = sshll.u32 %s3562_s10, 4  ;;  %s3344_s23 = int_to_ptr.vmem [resolvable:$false] %s3343_s23 }
 0x128   : > { %s3345_s13 = scalar_lea.vmem %s3344_s23, 32  ;;  %p3346_p6 = scmp.lt.s32.totalorder %s570_s5, %s3344_s23 }
 0x129   : > { %p3341_p4 = pnand %p3339_p12, %p4521_p0  ;;  %p3347_p11 = scmp.lt.s32.totalorder %s3345_s13, %s3338_s12 }
 0x12b   : > { %p3342_p3 = pneg %p3341_p4  ;;  %p3348_p7 = por %p3347_p11, %p3346_p6 }
 0x12d   : > { %p3349_p9 = pnand %p3348_p7, %p3342_p3 }
 0x12f   : > { %3352 = shalt.err (!%p3349_p9)
}
 0x130   : > { %p4526_p10 = scmp.ne.s32.totalorder %s4509_s14, 0  ;;  %s4527_s3 = scalar_lea.sflag [#allocation15], %s3695_s17 }
 0x131   : > { %s4528_s25 = sld [smem:[#allocation44_spill]]  ;;  %s596_s1 = scalar_lea.vmem [#allocation19], %s3698_s18 }
 0x132   : > { %2898 = dma.hbm_to_vmem [thread:$0]  (!%p4526_p10), %s4032_s8, 16, %s570_s5, %s4527_s3  }
 0x133   : > { %s603_s7 = sshll.u32 %s596_s1, 4  ;;  %s604_s7 = int_to_ptr.vmem [resolvable:$true] %s603_s7 }
 0x137   : > { %s4529_s22 = smov %s4528_s25  ;;  %s4058_s28 = scalar_lea.hbm %s4528_s25, %s3701_s19 }
 0x138   : > { %s3353_s12 = scalar_lea.hbm %s4058_s28, 16  ;;  %s3358_s8 = scalar_lea.hbm %s4529_s22, 32 }
 0x139   : > { %p3354_p7 = scmp.ne.s32.totalorder %s4058_s28, %s3353_s12  ;;  %p3359_p13 = scmp.lt.u32.totalorder %s4058_s28, %s4529_s22 }
 0x13a   : > { %p3360_p5 = scmp.lt.u32.totalorder %s3358_s8, %s3353_s12  ;;  %p3362_p12 = scmp.lt.u32.totalorder %s3353_s12, %s4058_s28 }
 0x13b   : > { %p3356_p2 = pnand %p3354_p7, %p4521_p0 }
 0x13c   : > { %p3361_p8 = por %p3360_p5, %p3359_p13 }
 0x13d   : > { %p3357_p1 = pneg %p3356_p2 }
 0x13e   : > { %p3363_p4 = por %p3362_p12, %p3361_p8 }
 0x140   : > { %p3364_p3 = pnand %p3363_p4, %p3357_p1 }
 0x142   : > { %3367 = shalt.err (!%p3364_p3)
}
 0x143   : > { %s3368_s3 = scalar_lea.vmem %s604_s7, 16  ;;  %s3563_s16 = smov [#allocation19]  }
 0x144   : > { %p3369_p6 = scmp.ne.s32.totalorder %s604_s7, %s3368_s3  ;;  %s3373_s15 = sshll.u32 %s3563_s16, 4  ;;  %s3374_s15 = int_to_ptr.vmem [resolvable:$false] %s3373_s15 }
 0x145   : > { %s3375_s25 = scalar_lea.vmem %s3374_s15, 32  ;;  %p3376_p7 = scmp.lt.s32.totalorder %s604_s7, %s3374_s15 }
 0x146   : > { %p3371_p11 = pnand %p3369_p6, %p4521_p0  ;;  %p3377_p2 = scmp.lt.s32.totalorder %s3375_s25, %s3368_s3 }
 0x148   : > { %p3372_p9 = pneg %p3371_p11  ;;  %p3378_p10 = por %p3377_p2, %p3376_p7 }
 0x14a   : > { %p3379_p5 = pnand %p3378_p10, %p3372_p9 }
 0x14c   : > { %3382 = shalt.err (!%p3379_p5)
}
 0x14d   : > { %p4530_p13 = scmp.ne.s32.totalorder %s4509_s14, 0  ;;  %s4531_s1 = scalar_lea.sflag [#allocation18], %s3695_s17 }
 0x14e   : > { %s4532_s23 = sld [smem:[#allocation45_spill]]  ;;  %s635_s5 = scalar_lea.vmem [#allocation22], %s3698_s18 }
 0x14f   : > { %2904 = dma.hbm_to_vmem [thread:$0]  (!%p4530_p13), %s4058_s28, 16, %s604_s7, %s4531_s1  }
 0x150   : > { %s643_s13 = sshll.u32 %s635_s5, 4  ;;  %s644_s13 = int_to_ptr.vmem [resolvable:$true] %s643_s13 }
 0x154   : > { %s4084_s8 = scalar_lea.hbm %s4532_s23, %s3701_s19  ;;  %s3388_s28 = scalar_lea.hbm %s4532_s23, 32 }
 0x155   : > { %s3383_s3 = scalar_lea.hbm %s4084_s8, 16  ;;  %p3389_p12 = scmp.lt.u32.totalorder %s4084_s8, %s4532_s23 }
 0x156   : > { %p3384_p10 = scmp.ne.s32.totalorder %s4084_s8, %s3383_s3  ;;  %p3390_p4 = scmp.lt.u32.totalorder %s3388_s28, %s3383_s3 }
 0x157   : > { %p3392_p6 = scmp.lt.u32.totalorder %s3383_s3, %s4084_s8 }
 0x158   : > { %p3386_p1 = pnand %p3384_p10, %p4521_p0  ;;  %p3391_p3 = por %p3390_p4, %p3389_p12 }
 0x15a   : > { %p3387_p8 = pneg %p3386_p1  ;;  %p3393_p11 = por %p3392_p6, %p3391_p3 }
 0x15c   : > { %p3394_p9 = pnand %p3393_p11, %p3387_p8 }
 0x15e   : > { %3397 = shalt.err (!%p3394_p9)
}
 0x15f   : > { %s3398_s1 = scalar_lea.vmem %s644_s13, 16  ;;  %s3564_s12 = smov [#allocation22]  }
 0x160   : > { %p3399_p7 = scmp.ne.s32.totalorder %s644_s13, %s3398_s1  ;;  %s3403_s10 = sshll.u32 %s3564_s12, 4  ;;  %s3404_s10 = int_to_ptr.vmem [resolvable:$false] %s3403_s10 }
 0x161   : > { %s3405_s5 = scalar_lea.vmem %s3404_s10, 32  ;;  %p3406_p10 = scmp.lt.s32.totalorder %s644_s13, %s3404_s10 }
 0x162   : > { %p3401_p2 = pnand %p3399_p7, %p4521_p0  ;;  %p3407_p1 = scmp.lt.s32.totalorder %s3405_s5, %s3398_s1 }
 0x164   : > { %p3402_p5 = pneg %p3401_p2  ;;  %p3408_p13 = por %p3407_p1, %p3406_p10 }
 0x166   : > { %p3409_p4 = pnand %p3408_p13, %p3402_p5 }
 0x168   : > { %3412 = shalt.err (!%p3409_p4)
}
 0x169   : > { %p4533_p12 = scmp.ne.s32.totalorder %s4509_s14, 0  ;;  %s4534_s3 = scalar_lea.sflag [#allocation21], %s3695_s17 }
 0x16a   : > { %s4535_s28 = sld [smem:[#allocation46_spill]]  ;;  %s676_s1 = scalar_lea.vmem [#allocation25], %s3698_s18 }
 0x16b   : > { %2910 = dma.hbm_to_vmem [thread:$0]  (!%p4533_p12), %s4084_s8, 16, %s644_s13, %s4534_s3  }
 0x16c   : > { %s683_s12 = sshll.u32 %s676_s1, 4  ;;  %s684_s12 = int_to_ptr.vmem [resolvable:$true] %s683_s12 }
 0x170   : > { %s4536_s7 = smov %s4535_s28  ;;  %s4110_s25 = scalar_lea.hbm %s4535_s28, %s3701_s19 }
 0x171   : > { %s3413_s10 = scalar_lea.hbm %s4110_s25, 16  ;;  %s3418_s8 = scalar_lea.hbm %s4536_s7, 32 }
 0x172   : > { %p3414_p13 = scmp.ne.s32.totalorder %s4110_s25, %s3413_s10  ;;  %p3419_p6 = scmp.lt.u32.totalorder %s4110_s25, %s4536_s7 }
 0x173   : > { %p3420_p11 = scmp.lt.u32.totalorder %s3418_s8, %s3413_s10  ;;  %p3422_p7 = scmp.lt.u32.totalorder %s3413_s10, %s4110_s25 }
 0x174   : > { %p3416_p8 = pnand %p3414_p13, %p4521_p0 }
 0x175   : > { %p3421_p9 = por %p3420_p11, %p3419_p6 }
 0x176   : > { %p3417_p3 = pneg %p3416_p8 }
 0x177   : > { %p3423_p2 = por %p3422_p7, %p3421_p9 }
 0x179   : > { %p3424_p5 = pnand %p3423_p2, %p3417_p3 }
 0x17b   : > { %3427 = shalt.err (!%p3424_p5)
}
 0x17c   : > { %s3428_s18 = scalar_lea.vmem %s684_s12, 16  ;;  %s3565_s19 = smov [#allocation25]  }
 0x17d   : > { %p3429_p10 = scmp.ne.s32.totalorder %s684_s12, %s3428_s18  ;;  %s3433_s16 = sshll.u32 %s3565_s19, 4  ;;  %s3434_s16 = int_to_ptr.vmem [resolvable:$false] %s3433_s16 }
 0x17e   : > { %s3435_s0 = scalar_lea.vmem %s3434_s16, 32  ;;  %p3436_p13 = scmp.lt.s32.totalorder %s684_s12, %s3434_s16 }
 0x17f   : > { %p3431_p1 = pnand %p3429_p10, %p4521_p0  ;;  %p3437_p8 = scmp.lt.s32.totalorder %s3435_s0, %s3428_s18 }
 0x181   : > { %p3432_p4 = pneg %p3431_p1  ;;  %p3438_p12 = por %p3437_p8, %p3436_p13 }
 0x183   : > { %p3439_p6 = pnand %p3438_p12, %p3432_p4 }
 0x185   : > { %3442 = shalt.err (!%p3439_p6)
}
 0x186   : > { %p4537_p11 = scmp.ne.s32.totalorder %s4509_s14, 0  ;;  %s4538_s15 = scalar_lea.sflag [#allocation24], %s3695_s17 }
 0x187   : > { %p4539_p3 = scmp.ne.s32.totalorder %s4518_s27, 0 }
 0x188   : > { %2916 = dma.hbm_to_vmem [thread:$0]  (!%p4537_p11), %s4110_s25, 16, %s684_s12, %s4538_s15  }
 0x189   : > { %692 = sbr.rel (%p4539_p3) target bundleno = 4627 (0x1213), region = 72  ;;  %p4540_p0 = scmp.eq.s32.totalorder (!%p4539_p3), %s3929_s24, 0 }
 0x190   : > { %3494 = dma.done.wait (%p4540_p0), [#allocation6], 256   ;;  %p4541_p9 = pmov %p4540_p0 }
 0x191   : > { %s4139_s21 = sand.u32 1, %s3929_s24   ;;  %s4142_s14 = sand.u32 1, %s3531_s26  }
 0x192   : > { %3496 = vsyncadd (%p4541_p9), [#allocation6], 4294967040  ;;  %s699_s17 = scalar_lea.sflag [#allocation9], %s4139_s21  ;;  %s701_s28 = scalar_lea.vmem [#allocation8], %s4142_s14 }
 0x193   : > { %p4542_p12 = scmp.ne.s32.totalorder %s4517_s20, 0 }
 0x195   : > { %3498 = dma.done.wait (%p4542_p12), %s699_s17, 32  }
 0x196   : > { %3500 = vsyncadd (%p4542_p12), %s699_s17, 4294967264  ;;  %s4151_s27 = sshll.u32 %s4142_s14, 4  ;;  %s709_s25 = scalar_lea.vmem [#allocation10], %s4142_s14 }
 0x197   : > { %s715_s1 = scalar_lea.sflag [#allocation12], %s4139_s21  ;;  %s718_s12 = scalar_lea.vmem [#allocation11], %s4151_s27 }
 0x198   : > { %3502 = dma.done.wait (%p4542_p12), %s715_s1, 272  }
 0x199   : > { %3504 = vsyncadd (%p4542_p12), %s715_s1, 4294967024  ;;  %s726_s10 = scalar_lea.vmem [#allocation13], %s4142_s14  ;;  %s732_s5 = scalar_lea.sflag [#allocation15], %s4139_s21 }
 0x19a   : > { %s735_s8 = scalar_lea.vmem [#allocation14], %s4151_s27 }
 0x19b   : > { %3506 = dma.done.wait (%p4542_p12), %s732_s5, 272  }
 0x19c   : > { %3508 = vsyncadd (%p4542_p12), %s732_s5, 4294967024  ;;  %s743_s13 = scalar_lea.vmem [#allocation16], %s4142_s14  ;;  %s749_s3 = scalar_lea.sflag [#allocation18], %s4139_s21 }
 0x19d   : > { %s751_s18 = scalar_lea.vmem [#allocation17], %s4142_s14 }
 0x19e   : > { %3510 = dma.done.wait (%p4542_p12), %s749_s3, 32  }
 0x19f   : > { %3512 = vsyncadd (%p4542_p12), %s749_s3, 4294967264  ;;  %s765_s16 = scalar_lea.sflag [#allocation21], %s4139_s21  ;;  %s768_s0 = scalar_lea.vmem [#allocation20], %s4151_s27 }
 0x1a0   : > { %3514 = dma.done.wait (%p4542_p12), %s765_s16, 272  }
 0x1a1   : > { %3516 = vsyncadd (%p4542_p12), %s765_s16, 4294967024  ;;  %s2592_s15 = sshll.u32 %s4142_s14, 6  ;;  %s776_s17 = scalar_lea.vmem [#allocation22], %s4142_s14 }
 0x1a2   : > { %s782_s1 = scalar_lea.sflag [#allocation24], %s4139_s21  ;;  %s4184_s5 = scalar_lea.vmem [#allocation23], %s2592_s15 }
 0x1a3   : > { %3518 = dma.done.wait (%p4542_p12), %s782_s1, 1040  }
 0x1a4   : > { %3520 = vsyncadd (%p4542_p12), %s782_s1, 4294966256  ;;  %s4543_s3 = sld [smem:[#allocation36_spill]]  ;;  %s793_s19 = scalar_lea.vmem [#allocation25], %s4142_s14 }
 0x1aa   : > { %p882_p7 = scmp.eq.s32.totalorder %s4543_s3, 0 }
 0x1ab   : > { %v888_v0 = vld [vmem:[#allocation5] sm:$0xff] (%p882_p7)  ;;  %vm890_vm0 = vcmask (%p882_p7), 261120   ;;  %v889_v1 = vld [vmem:[#allocation5 + $0x8] sm:$0xff] (%p882_p7) }
 0x1ac   : > { %887 = sbr.rel (!%p882_p7) target bundleno = 435 (0x1b3), region = 128  ;;  %891 = vst.msk [vmem:[#allocation2] sm:$0xff] (%p882_p7), %vm890_vm0, %v888_v0  ;;  %892 = vst.msk [vmem:[#allocation2 + $0x8] sm:$0xff] (%p882_p7), %vm890_vm0, %v889_v1 }
 0x1b3 PF: > { %v4192_v2 = vld [vmem:[#allocation2] sm:$0xff]  ;;  %vm900_vm1 = vcmask 261120   ;;  %v4194_v3 = vld [vmem:[#allocation2 + $0x8] sm:$0xff]  ;;  %v3566_v17 = vmov 0.0   ;;  %vm3567_vm2 = vmmov 0   ;;  %s3568_s20 = smov 96  }
 0x1b4   : > { %v901_v4 = vsel %vm900_vm1, %v4192_v2, 0.0  ;;  %v904_v5 = vsel %vm900_vm1, %v4194_v3, 0.0  ;;  %v2993_v16 = vld [vmem:[%s718_s12] sm:$0xff]   ;;  %2704 = vmatprep.subr.bf16.mxu0 %v3566_v17  ;;  %2724 = vmatprep.subr.bf16.mxu1 %v3566_v17  ;;  %v2994_v18 = vld [vmem:[%s718_s12 + $0x8] sm:$0xff]   ;;  %vm1027_vm3 = vcmask 64512   ;;  %s3569_s21 = smov 64  }
 0x1b5   : > { %902 = vadd.xlane.f32.xlu0 %v901_v4  ;;  %2705 = vmatpush3.bf16.msra.mxu0 %v2993_v16  ;;  %v2594_v27 = vld [vmem:[%s701_s28] ss:$0 sm:$0xff]  ;;  %s3570_s28 = smov 88   ;;  %vm1152_vm4 = vcmask 1043456   ;;  %s3572_s12 = smov 56   ;;  %vm1471_vm5 = vcmask 130112  }
 0x1b6   : > { %2708 = vmatprep.mubr.msk.bf16.mxu0 %vm3567_vm2, %v3566_v17  ;;  %2706 = vmatprep.subr.bf16.mxu0 %v3566_v17  ;;  %v2595_v31 = vld [vmem:[%s709_s25] ss:$0 sm:$0xff]  ;;  %s3571_s25 = smov 120   ;;  %s3574_s16 = smov 112   ;;  %vm1698_vm6 = vcmask 195712   ;;  %vm1925_vm7 = vcmask 261312  }
 0x1b7   : > { %2726 = vmatprep.mubr.msk.bf16.mxu1 %vm3567_vm2, %v3566_v17  ;;  %v2596_v36 = vld [vmem:[%s726_s10] ss:$0 sm:$0xff]  ;;  %s3573_s10 = smov 80   ;;  %s3575_s15 = smov 48  }
 0x1b8   : > { %s3576_s1 = smov 72   ;;  %s3577_s3 = smov 104  }
 0x1b9   : > { %905 = vadd.xlane.f32.xlu0 %v904_v5  ;;  %2707 = vmatpush3.bf16.msra.mxu0 %v2994_v18  ;;  %s4544_s27 = scalar_lea.vmem [#allocation19], %s4142_s14 }
 0x1ba   : > { %2712 = vmatprep.subr.bf16.mxu0 %v3566_v17 }
 0x242   : > { %v903_v6 = vpop.xlane.xlu0 %902 }
 0x243   : > { %v908_v7 = vmul.f32 0.03125, %v903_v6 }
 0x245   : > { %v910_v8 = vsub.f32 %v4192_v2, %v908_v7 }
 0x246   : > { %v906_v9 = vpop.xlane.xlu0 %905 }
 0x247   : > { %v909_v10 = vmul.f32 0.03125, %v906_v9  ;;  %v912_v11 = vmul.f32 %v910_v8, %v910_v8 }
 0x249   : > { %v911_v12 = vsub.f32 %v4194_v3, %v909_v10  ;;  %v914_v13 = vsel %vm900_vm1, %v912_v11, 0.0 }
 0x24a   : > { %915 = vadd.xlane.f32.xlu1 %v914_v13 }
 0x24b   : > { %v913_v14 = vmul.f32 %v911_v12, %v911_v12 }
 0x24d   : > { %v917_v15 = vsel %vm900_vm1, %v913_v14, 0.0 }
 0x24e   : > { %918 = vadd.xlane.f32.xlu1 %v917_v15 }
 0x2d7   : > { %v916_v19 = vpop.xlane.xlu1 %915 }
 0x2d8   : > { %v920_v20 = vmul.f32 0.03125, %v916_v19 }
 0x2da   : > { %v922_v21 = vadd.f32 1e-05, %v920_v20 }
 0x2db   : > { %v919_v22 = vpop.xlane.xlu1 %918 }
 0x2dc   : > { %3007 = vrsqrt.f32 %v922_v21  ;;  %v921_v23 = vmul.f32 0.03125, %v919_v22 }
 0x2de   : > { %v923_v24 = vadd.f32 1e-05, %v921_v23 }
 0x2e0   : > { %3009 = vrsqrt.f32 %v923_v24 }
 0x2e6   : > { %v3008_v25 = vpop.eup %3007 }
 0x2e7   : > { %v926_v26 = vmul.f32 %v3008_v25, %v910_v8 }
 0x2e9   : > { %v934_v30 = vmul.f32 %v2594_v27, %v926_v26 }
 0x2ea   : > { %v3010_v28 = vpop.eup %3009 }
 0x2eb   : > { %v927_v29 = vmul.f32 %v3010_v28, %v911_v12  ;;  %v942_v33 = vadd.f32 %v2595_v31, %v934_v30 }
 0x2ed   : > { %v935_v32 = vmul.f32 %v2594_v27, %v927_v29 }
 0x2ef   : > { %v943_v34 = vadd.f32 %v2595_v31, %v935_v32 }
 0x2f1   : > { %v944_v35 = vpack.c.bf16 %v943_v34, %v942_v33 }
 0x2f3   : > { %2709 = vmatmul.mubr.msk.bf16.vlgmr.msra.gmra.mrb[0].mxu0 %vm900_vm1, %v944_v35 }
 0x2f4   : > { %2714 = vmatprep.mubr.msk.bf16.mxu0 %vm3567_vm2, %v3566_v17 }
 0x3c6   : > { %v1005_v37 = vpop.f32.mrb[0].mxu0 }
 0x3c7   : > { %v1006_v38 = vadd.f32 %v2596_v36, %v1005_v37  ;;  %v2710_v39 = vpop.f32.mrb[1].mxu0 }
 0x3c8   : > { %v1008_v40 = vpop.f32.mrb[2].mxu0 }
 0x3c9   : > { %v4225_v41 = vpack.c.bf16 %v1006_v38, %v1006_v38  ;;  %v1009_v42 = vadd.f32 %v2596_v36, %v1008_v40  ;;  %v2711_v43 = vpop.f32.mrb[3].mxu0  ;;  %v1012_v47 = vmul.f32 0.35355338, %v1006_v38 }
 0x3cb   : > { %v4227_v44 = vpack.c.bf16 %v1009_v42, %v1009_v42  ;;  %1025 = vrot.lane.b32.xlu0 %v4225_v41, %s3568_s20  ;;  %v4233_v49 = vpack.c.bf16 %v1012_v47, %v1012_v47  ;;  %v1013_v51 = vmul.f32 0.35355338, %v1009_v42 }
 0x3cd   : > { %1075 = vrot.lane.b32.xlu1 %v4227_v44, %s3568_s20  ;;  %v4241_v52 = vpack.c.bf16 %v1013_v51, %v1013_v51  ;;  %s3578_s20 = smov 40  }
 0x43d   : > { %v1026_v45 = vpop.permute.xlu0 %1025 }
 0x43e   : > { %v1032_v46 = vsel %vm1027_vm3, %v1026_v45, 0 }
 0x43f   : > { %2713 = vmatpush3.bf16.xpose.msra.mxu0 %v1032_v46  ;;  %v1076_v48 = vpop.permute.xlu1 %1075 }
 0x440   : > { %2718 = vmatprep.subr.bf16.mxu0 %v3566_v17  ;;  %v1081_v50 = vsel %vm1027_vm3, %v1076_v48, 0 }
 0x446   : > { %2715 = vmatmul.mubr.msk.bf16.vlgmr.msra.gmra.mrb[4].mxu0 %vm1027_vm3, %v4233_v49 }
 0x447   : > { %2719 = vmatpush3.bf16.xpose.msra.mxu0 %v1081_v50  ;;  %2720 = vmatprep.mubr.msk.bf16.mxu0 %vm3567_vm2, %v3566_v17 }
 0x448   : > { %2730 = vmatprep.subr.bf16.mxu0 %v3566_v17 }
 0x44e   : > { %2721 = vmatmul.mubr.msk.bf16.vlgmr.msra.gmra.mrb[8].mxu0 %vm1027_vm3, %v4241_v52 }
 0x44f   : > { %2732 = vmatprep.mubr.msk.bf16.mxu0 %vm3567_vm2, %v3566_v17 }
 0x519   : > { %v1068_v53 = vpop.f32.mrb[4].mxu0 }
 0x51a   : > { %v2716_v54 = vpop.f32.mrb[5].mxu0  ;;  %v1123_v55 = vsel %vm1027_vm3, %v1068_v53, -inf }
 0x51b   : > { %1124 = vmax.xlane.f32.xlu1 %v1123_v55  ;;  %v1071_v56 = vpop.f32.mrb[6].mxu0 }
 0x51c   : > { %v2717_v57 = vpop.f32.mrb[7].mxu0 }
 0x521   : > { %v1117_v58 = vpop.f32.mrb[8].mxu0 }
 0x522   : > { %v2722_v59 = vpop.f32.mrb[9].mxu0  ;;  %v1126_v60 = vsel %vm1027_vm3, %v1117_v58, -inf }
 0x523   : > { %1127 = vmax.xlane.f32.xlu0 %v1126_v60  ;;  %v1120_v61 = vpop.f32.mrb[10].mxu0 }
 0x524   : > { %v2723_v62 = vpop.f32.mrb[11].mxu0 }
 0x52c   : > { %1196 = vrot.lane.b32.xlu1 %v4227_v44, %s3569_s21 }
 0x530   : > { %1248 = vrot.lane.b32.xlu1 %v4225_v41, %s3570_s28 }
 0x5a8   : > { %v1125_v63 = vpop.xlane.xlu1 %1124 }
 0x5a9   : > { %v1129_v0 = vsub.f32 %v1068_v53, %v1125_v63 }
 0x5ab   : > { %v1131_v1 = vmul.f32 1.442695, %v1129_v0 }
 0x5ac   : > { %v1197_v4 = vpop.permute.xlu1 %1196 }
 0x5ad   : > { %3011 = vpow2.f32 %v1131_v1  ;;  %v1202_v5 = vsel %vm1152_vm4, %v1197_v4, 0 }
 0x5ae   : > { %2731 = vmatpush3.bf16.msra.mxu0 %v1202_v5 }
 0x5af   : > { %2742 = vmatprep.subr.bf16.mxu0 %v3566_v17 }
 0x5b0   : > { %v1128_v6 = vpop.xlane.xlu0 %1127  ;;  %v1249_v14 = vpop.permute.xlu1 %1248 }
 0x5b1   : > { %v1130_v7 = vsub.f32 %v1117_v58, %v1128_v6  ;;  %v1254_v22 = vsel %vm1027_vm3, %v1249_v14, 0 }
 0x5b3   : > { %v1133_v8 = vmul.f32 1.442695, %v1130_v7 }
 0x5b5   : > { %3013 = vpow2.f32 %v1133_v8 }
 0x5b7   : > { %v3012_v9 = vpop.eup %3011 }
 0x5b8   : > { %v1135_v10 = vsel %vm1027_vm3, %v3012_v9, 0.0 }
 0x5b9   : > { %1136 = vadd.xlane.f32.xlu0 %v1135_v10 }
 0x5bf   : > { %v3014_v11 = vpop.eup %3013 }
 0x5c0   : > { %v1138_v12 = vsel %vm1027_vm3, %v3014_v11, 0.0 }
 0x5c1   : > { %1139 = vadd.xlane.f32.xlu1 %v1138_v12 }
 0x5cf   : > { %1147 = vrot.lane.b32.xlu0 %v4225_v41, %s3569_s21  ;;  %s3579_s21 = smov 8  }
 0x5d2   : > { %1298 = vrot.lane.b32.xlu1 %v4227_v44, %s3570_s28  ;;  %s3580_s28 = smov 16  }
 0x5d3   : > { %1246 = vrot.lane.b32.xlu0 %v4233_v49, %s3571_s25 }
 0x5d6   : > { %1296 = vrot.lane.b32.xlu1 %v4241_v52, %s3571_s25  ;;  %s3581_s25 = smov 24  }
 0x646   : > { %v1137_v13 = vpop.xlane.xlu0 %1136 }
 0x647   : > { %3015 = vrcp.f32 %v1137_v13 }
 0x64a   : > { %v1148_v15 = vpop.permute.xlu0 %1147 }
 0x64b   : > { %v1154_v16 = vsel %vm1152_vm4, %v1148_v15, 0 }
 0x64c   : > { %2725 = vmatpush3.bf16.msra.mxu1 %v1154_v16 }
 0x64d   : > { %2736 = vmatprep.subr.bf16.mxu1 %v3566_v17 }
 0x64e   : > { %v1140_v18 = vpop.xlane.xlu1 %1139  ;;  %v1247_v27 = vpop.permute.xlu0 %1246 }
 0x64f   : > { %3017 = vrcp.f32 %v1140_v18 }
 0x651   : > { %v3016_v19 = vpop.eup %3015 }
 0x652   : > { %v1143_v20 = vmul.f32 %v3016_v19, %v3012_v9  ;;  %v1299_v25 = vpop.permute.xlu1 %1298 }
 0x653   : > { %v1304_v28 = vsel %vm1027_vm3, %v1299_v25, 0 }
 0x654   : > { %v1145_v21 = vpack.c.bf16 %v1143_v20, %v1143_v20 }
 0x656   : > { %2727 = vmatmul.mubr.msk.bf16.vlgmr.msra.gmra.mrb[0].mxu1 %vm1027_vm3, %v1145_v21  ;;  %v1297_v29 = vpop.permute.xlu1 %1296 }
 0x657   : > { %2737 = vmatpush3.bf16.xpose.msra.mxu1 %v1254_v22  ;;  %2738 = vmatprep.mubr.msk.bf16.mxu1 %vm3567_vm2, %v3566_v17 }
 0x658   : > { %2748 = vmatprep.subr.bf16.mxu1 %v3566_v17 }
 0x659   : > { %v3018_v23 = vpop.eup %3017 }
 0x65a   : > { %v1144_v24 = vmul.f32 %v3018_v23, %v3014_v11 }
 0x65c   : > { %v1146_v26 = vpack.c.bf16 %v1144_v24, %v1144_v24 }
 0x65e   : > { %2733 = vmatmul.mubr.msk.bf16.vlgmr.msra.gmra.mrb[12].mxu0 %vm1027_vm3, %v1146_v26  ;;  %2739 = vmatmul.mubr.msk.bf16.vlgmr.msra.gmra.mrb[4].mxu1 %vm1027_vm3, %v1247_v27 }
 0x65f   : > { %2743 = vmatpush3.bf16.xpose.msra.mxu0 %v1304_v28  ;;  %2744 = vmatprep.mubr.msk.bf16.mxu0 %vm3567_vm2, %v3566_v17 }
 0x660   : > { %2754 = vmatprep.subr.bf16.mxu0 %v3566_v17  ;;  %2750 = vmatprep.mubr.msk.bf16.mxu1 %vm3567_vm2, %v3566_v17 }
 0x666   : > { %2745 = vmatmul.mubr.msk.bf16.vlgmr.msra.gmra.mrb[16].mxu0 %vm1027_vm3, %v1297_v29 }
 0x667   : > { %2756 = vmatprep.mubr.msk.bf16.mxu0 %vm3567_vm2, %v3566_v17 }
 0x729   : > { %v1190_v30 = vpop.f32.mrb[0].mxu1 }
 0x72a   : > { %v2728_v31 = vpop.f32.mrb[1].mxu1 }
 0x72b   : > { %v1193_v32 = vpop.f32.mrb[2].mxu1 }
 0x72c   : > { %v2729_v33 = vpop.f32.mrb[3].mxu1 }
 0x731   : > { %v1238_v34 = vpop.f32.mrb[12].mxu0  ;;  %v1290_v35 = vpop.f32.mrb[4].mxu1 }
 0x732   : > { %v1244_v36 = vpack.c.bf16 %v1238_v34, %v1190_v30  ;;  %v2734_v37 = vpop.f32.mrb[13].mxu0  ;;  %v2740_v38 = vpop.f32.mrb[5].mxu1  ;;  %v1346_v39 = vsel %vm1027_vm3, %v1290_v35, -inf }
 0x733   : > { %1347 = vmax.xlane.f32.xlu0 %v1346_v39  ;;  %v1241_v40 = vpop.f32.mrb[14].mxu0  ;;  %v1293_v42 = vpop.f32.mrb[6].mxu1 }
 0x734   : > { %1245 = vst.msk [vmem:[#allocation3] sm:$0xff] %vm1027_vm3, %v1244_v36  ;;  %v2735_v43 = vpop.f32.mrb[15].mxu0  ;;  %v2741_v45 = vpop.f32.mrb[7].mxu1 }
 0x739   : > { %v1340_v46 = vpop.f32.mrb[16].mxu0 }
 0x73a   : > { %v2746_v47 = vpop.f32.mrb[17].mxu0  ;;  %v1349_v48 = vsel %vm1027_vm3, %v1340_v46, -inf }
 0x73b   : > { %1350 = vmax.xlane.f32.xlu1 %v1349_v48  ;;  %v1343_v50 = vpop.f32.mrb[18].mxu0 }
 0x73c   : > { %v2747_v51 = vpop.f32.mrb[19].mxu0 }
 0x74c   : > { %1418 = vrot.lane.b32.xlu1 %v4227_v44, %s3572_s12 }
 0x750   : > { %1475 = vrot.lane.b32.xlu1 %v4225_v41, %s3573_s10 }
 0x754   : > { %1525 = vrot.lane.b32.xlu1 %v4227_v44, %s3573_s10 }
 0x758   : > { %1523 = vrot.lane.b32.xlu1 %v4241_v52, %s3574_s16 }
 0x7c0   : > { %v1348_v53 = vpop.xlane.xlu0 %1347 }
 0x7c1   : > { %v1352_v54 = vsub.f32 %v1290_v35, %v1348_v53 }
 0x7c3   : > { %v1354_v55 = vmul.f32 1.442695, %v1352_v54 }
 0x7c5   : > { %3019 = vpow2.f32 %v1354_v55 }
 0x7c8   : > { %v1351_v56 = vpop.xlane.xlu1 %1350 }
 0x7c9   : > { %v1353_v57 = vsub.f32 %v1340_v46, %v1351_v56 }
 0x7cb   : > { %v1356_v58 = vmul.f32 1.442695, %v1353_v57 }
 0x7cc   : > { %v1419_v59 = vpop.permute.xlu1 %1418 }
 0x7cd   : > { %3021 = vpow2.f32 %v1356_v58  ;;  %v1424_v60 = vsel %vm1152_vm4, %v1419_v59, 0 }
 0x7ce   : > { %2755 = vmatpush3.bf16.msra.mxu0 %v1424_v60 }
 0x7cf   : > { %v3020_v61 = vpop.eup %3019  ;;  %2766 = vmatprep.subr.bf16.mxu0 %v3566_v17 }
 0x7d0   : > { %v1358_v62 = vsel %vm1027_vm3, %v3020_v61, 0.0  ;;  %v1476_v10 = vpop.permute.xlu1 %1475 }
 0x7d1   : > { %1359 = vadd.xlane.f32.xlu0 %v1358_v62  ;;  %v1481_v14 = vsel %vm1027_vm3, %v1476_v10, 0 }
 0x7d4   : > { %v1526_v13 = vpop.permute.xlu1 %1525 }
 0x7d5   : > { %v1531_v16 = vsel %vm1027_vm3, %v1526_v13, 0 }
 0x7d7   : > { %v3022_v63 = vpop.eup %3021 }
 0x7d8   : > { %v1361_v0 = vsel %vm1027_vm3, %v3022_v63, 0.0  ;;  %v1524_v19 = vpop.permute.xlu1 %1523 }
 0x7d9   : > { %1362 = vadd.xlane.f32.xlu0 %v1361_v0 }
 0x7ef   : > { %1370 = vrot.lane.b32.xlu0 %v4225_v41, %s3572_s12 }
 0x7f3   : > { %1473 = vrot.lane.b32.xlu0 %v4233_v49, %s3574_s16 }
 0x85e   : > { %v1360_v1 = vpop.xlane.xlu0 %1359 }
 0x85f   : > { %3023 = vrcp.f32 %v1360_v1 }
 0x866   : > { %v1363_v4 = vpop.xlane.xlu0 %1362 }
 0x867   : > { %3025 = vrcp.f32 %v1363_v4 }
 0x869   : > { %v3024_v5 = vpop.eup %3023 }
 0x86a   : > { %v1366_v6 = vmul.f32 %v3024_v5, %v3020_v61  ;;  %v1371_v7 = vpop.permute.xlu0 %1370 }
 0x86b   : > { %v1376_v8 = vsel %vm1152_vm4, %v1371_v7, 0 }
 0x86c   : > { %2749 = vmatpush3.bf16.msra.mxu1 %v1376_v8  ;;  %v1368_v9 = vpack.c.bf16 %v1366_v6, %v1366_v6 }
 0x86d   : > { %2760 = vmatprep.subr.bf16.mxu1 %v3566_v17 }
 0x86e   : > { %v1474_v18 = vpop.permute.xlu0 %1473 }
 0x86f   : > { %2751 = vmatmul.mubr.msk.bf16.vlgmr.msra.gmra.mrb[8].mxu1 %vm1027_vm3, %v1368_v9 }
 0x870   : > { %2762 = vmatprep.mubr.msk.bf16.mxu1 %vm3567_vm2, %v3566_v17 }
 0x871   : > { %v3026_v11 = vpop.eup %3025 }
 0x872   : > { %v1367_v12 = vmul.f32 %v3026_v11, %v3022_v63 }
 0x874   : > { %v1369_v15 = vpack.c.bf16 %v1367_v12, %v1367_v12 }
 0x875   : > { %2761 = vmatpush3.bf16.xpose.msra.mxu1 %v1481_v14 }
 0x876   : > { %2757 = vmatmul.mubr.msk.bf16.vlgmr.msra.gmra.mrb[20].mxu0 %vm1027_vm3, %v1369_v15  ;;  %2772 = vmatprep.subr.bf16.mxu1 %v3566_v17 }
 0x877   : > { %2767 = vmatpush3.bf16.xpose.msra.mxu0 %v1531_v16  ;;  %2768 = vmatprep.mubr.msk.bf16.mxu0 %vm3567_vm2, %v3566_v17 }
 0x878   : > { %2778 = vmatprep.subr.bf16.mxu0 %v3566_v17 }
 0x87c   : > { %2763 = vmatmul.mubr.msk.bf16.vlgmr.msra.gmra.mrb[12].mxu1 %vm1027_vm3, %v1474_v18 }
 0x87d   : > { %2774 = vmatprep.mubr.msk.bf16.mxu1 %vm3567_vm2, %v3566_v17 }
 0x87e   : > { %2769 = vmatmul.mubr.msk.bf16.vlgmr.msra.gmra.mrb[24].mxu0 %vm1027_vm3, %v1524_v19 }
 0x87f   : > { %2780 = vmatprep.mubr.msk.bf16.mxu0 %vm3567_vm2, %v3566_v17 }
 0x942   : > { %v4308_v20 = vpop.f32.mrb[8].mxu1 }
 0x943   : > { %v2752_v21 = vpop.f32.mrb[9].mxu1 }
 0x944   : > { %v1415_v22 = vpop.f32.mrb[10].mxu1 }
 0x945   : > { %v2753_v23 = vpop.f32.mrb[11].mxu1 }
 0x949   : > { %v4310_v24 = vpop.f32.mrb[20].mxu0 }
 0x94a   : > { %v1466_v25 = vpack.c.bf16 %v4310_v24, %v4308_v20  ;;  %v2758_v26 = vpop.f32.mrb[21].mxu0 }
 0x94b   : > { %v1463_v27 = vpop.f32.mrb[22].mxu0 }
 0x94c   : > { %v2759_v28 = vpop.f32.mrb[23].mxu0 }
 0x94f   : > { %v1517_v29 = vpop.f32.mrb[12].mxu1 }
 0x950   : > { %v2764_v30 = vpop.f32.mrb[13].mxu1  ;;  %v1573_v31 = vsel %vm1027_vm3, %v1517_v29, -inf }
 0x951   : > { %1574 = vmax.xlane.f32.xlu0 %v1573_v31  ;;  %v1520_v32 = vpop.f32.mrb[14].mxu1  ;;  %v1567_v33 = vpop.f32.mrb[24].mxu0 }
 0x952   : > { %v2765_v34 = vpop.f32.mrb[15].mxu1  ;;  %v2770_v35 = vpop.f32.mrb[25].mxu0  ;;  %v1576_v36 = vsel %vm1027_vm3, %v1567_v33, -inf }
 0x953   : > { %1577 = vmax.xlane.f32.xlu1 %v1576_v36  ;;  %v1570_v37 = vpop.f32.mrb[26].mxu0 }
 0x954   : > { %v2771_v38 = vpop.f32.mrb[27].mxu0 }
 0x964   : > { %1645 = vrot.lane.b32.xlu1 %v4227_v44, %s3575_s15 }
 0x968   : > { %1702 = vrot.lane.b32.xlu1 %v4225_v41, %s3576_s1 }
 0x96c   : > { %1752 = vrot.lane.b32.xlu1 %v4227_v44, %s3576_s1 }
 0x970   : > { %1750 = vrot.lane.b32.xlu1 %v4241_v52, %s3577_s3 }
 0x9de   : > { %v1575_v39 = vpop.xlane.xlu0 %1574 }
 0x9df   : > { %v1579_v40 = vsub.f32 %v1517_v29, %v1575_v39 }
 0x9e0   : > { %v1578_v42 = vpop.xlane.xlu1 %1577 }
 0x9e1   : > { %v1581_v43 = vmul.f32 1.442695, %v1579_v40  ;;  %v1580_v45 = vsub.f32 %v1567_v33, %v1578_v42 }
 0x9e3   : > { %3027 = vpow2.f32 %v1581_v43  ;;  %v1583_v46 = vmul.f32 1.442695, %v1580_v45 }
 0x9e4   : > { %v1646_v47 = vpop.permute.xlu1 %1645 }
 0x9e5   : > { %3029 = vpow2.f32 %v1583_v46  ;;  %v1651_v48 = vsel %vm1152_vm4, %v1646_v47, 0 }
 0x9e6   : > { %2779 = vmatpush3.bf16.msra.mxu0 %v1651_v48 }
 0x9e7   : > { %2790 = vmatprep.subr.bf16.mxu0 %v3566_v17 }
 0x9e8   : > { %v1703_v59 = vpop.permute.xlu1 %1702 }
 0x9ec   : > { %v1753_v0 = vpop.permute.xlu1 %1752 }
 0x9ed   : > { %v3028_v50 = vpop.eup %3027  ;;  %v1758_v4 = vsel %vm1027_vm3, %v1753_v0, 0 }
 0x9ee   : > { %v1585_v51 = vsel %vm1027_vm3, %v3028_v50, 0.0 }
 0x9ef   : > { %v3030_v53 = vpop.eup %3029  ;;  %1586 = vadd.xlane.f32.xlu0 %v1585_v51 }
 0x9f0   : > { %v1588_v52 = vsel %vm1027_vm3, %v3030_v53, 0.0  ;;  %v1751_v6 = vpop.permute.xlu1 %1750 }
 0x9f3   : > { %1589 = vadd.xlane.f32.xlu0 %v1588_v52  ;;  %v2996_v52 = vld [vmem:[%s735_s8 + $0x8] sm:$0xff]  }
 0xa09   : > { %1597 = vrot.lane.b32.xlu0 %v4225_v41, %s3575_s15 }
 0xa0d   : > { %1700 = vrot.lane.b32.xlu0 %v4233_v49, %s3577_s3  ;;  %v1708_v49 = vsel %vm1027_vm3, %v1703_v59, 0 }
 0xa7c   : > { %v1587_v54 = vpop.xlane.xlu0 %1586 }
 0xa7d   : > { %3031 = vrcp.f32 %v1587_v54 }
 0xa80   : > { %v1590_v55 = vpop.xlane.xlu0 %1589 }
 0xa81   : > { %3033 = vrcp.f32 %v1590_v55 }
 0xa84   : > { %v1598_v56 = vpop.permute.xlu0 %1597 }
 0xa85   : > { %v1603_v57 = vsel %vm1152_vm4, %v1598_v56, 0 }
 0xa86   : > { %2773 = vmatpush3.bf16.msra.mxu1 %v1603_v57 }
 0xa87   : > { %v3032_v58 = vpop.eup %3031  ;;  %2784 = vmatprep.subr.bf16.mxu1 %v3566_v17 }
 0xa88   : > { %v1593_v60 = vmul.f32 %v3032_v58, %v3028_v50  ;;  %v1701_v5 = vpop.permute.xlu0 %1700 }
 0xa8a   : > { %v1595_v61 = vpack.c.bf16 %v1593_v60, %v1593_v60 }
 0xa8b   : > { %v3034_v62 = vpop.eup %3033 }
 0xa8c   : > { %v1594_v63 = vmul.f32 %v3034_v62, %v3030_v53  ;;  %2775 = vmatmul.mubr.msk.bf16.vlgmr.msra.gmra.mrb[16].mxu1 %vm1027_vm3, %v1595_v61  ;;  %v2995_v53 = vld [vmem:[%s735_s8] sm:$0xff]   ;;  %s4545_s8 = sld [smem:[#allocation36_spill]] }
 0xa8d   : > { %2786 = vmatprep.mubr.msk.bf16.mxu1 %vm3567_vm2, %v3566_v17 }
 0xa8e   : > { %v1596_v1 = vpack.c.bf16 %v1594_v63, %v1594_v63 }
 0xa8f   : > { %2785 = vmatpush3.bf16.xpose.msra.mxu1 %v1708_v49  ;;  %v2620_v49 = vld [vmem:[%s743_s13] ss:$0 sm:$0xff] }
 0xa90   : > { %2781 = vmatmul.mubr.msk.bf16.vlgmr.msra.gmra.mrb[28].mxu0 %vm1027_vm3, %v1596_v1  ;;  %2796 = vmatprep.subr.bf16.mxu1 %v3566_v17 }
 0xa91   : > { %2791 = vmatpush3.bf16.xpose.msra.mxu0 %v1758_v4  ;;  %2792 = vmatprep.mubr.msk.bf16.mxu0 %vm3567_vm2, %v3566_v17 }
 0xa92   : > { %2802 = vmatprep.subr.bf16.mxu0 %v3566_v17  ;;  %p2247_p2 = scmp.eq.s32.totalorder %s4545_s8, 1 }
 0xa96   : > { %2787 = vmatmul.mubr.msk.bf16.vlgmr.msra.gmra.mrb[20].mxu1 %vm1027_vm3, %v1701_v5 }
 0xa97   : > { %2798 = vmatprep.mubr.msk.bf16.mxu1 %vm3567_vm2, %v3566_v17 }
 0xa98   : > { %2793 = vmatmul.mubr.msk.bf16.vlgmr.msra.gmra.mrb[32].mxu0 %vm1027_vm3, %v1751_v6  ;;  %v2626_v6 = vld [vmem:[%s793_s19] ss:$0 sm:$0xff] }
 0xa99   : > { %2804 = vmatprep.mubr.msk.bf16.mxu0 %vm3567_vm2, %v3566_v17 }
 0xb5f   : > { %v1639_v7 = vpop.f32.mrb[16].mxu1 }
 0xb60   : > { %v2776_v8 = vpop.f32.mrb[17].mxu1 }
 0xb61   : > { %v1642_v9 = vpop.f32.mrb[18].mxu1 }
 0xb62   : > { %v2777_v10 = vpop.f32.mrb[19].mxu1 }
 0xb63   : > { %v1687_v11 = vpop.f32.mrb[28].mxu0 }
 0xb64   : > { %v1693_v12 = vpack.c.bf16 %v1687_v11, %v1639_v7  ;;  %v2782_v13 = vpop.f32.mrb[29].mxu0 }
 0xb65   : > { %v1690_v14 = vpop.f32.mrb[30].mxu0 }
 0xb66   : > { %v2783_v15 = vpop.f32.mrb[31].mxu0 }
 0xb69   : > { %v1744_v16 = vpop.f32.mrb[20].mxu1 }
 0xb6a   : > { %v2788_v18 = vpop.f32.mrb[21].mxu1  ;;  %v1800_v19 = vsel %vm1027_vm3, %v1744_v16, -inf }
 0xb6b   : > { %1801 = vmax.xlane.f32.xlu0 %v1800_v19  ;;  %v1747_v21 = vpop.f32.mrb[22].mxu1  ;;  %v1794_v22 = vpop.f32.mrb[32].mxu0 }
 0xb6c   : > { %v2789_v23 = vpop.f32.mrb[23].mxu1  ;;  %v2794_v26 = vpop.f32.mrb[33].mxu0  ;;  %v1803_v27 = vsel %vm1027_vm3, %v1794_v22, -inf }
 0xb6d   : > { %1804 = vmax.xlane.f32.xlu1 %v1803_v27  ;;  %v1797_v28 = vpop.f32.mrb[34].mxu0 }
 0xb6e   : > { %v2795_v29 = vpop.f32.mrb[35].mxu0  ;;  %v2997_v28 = vld [vmem:[%s768_s0] sm:$0xff]  }
 0xb6f   : > { %v2998_v29 = vld [vmem:[%s768_s0 + $0x8] sm:$0xff]  }
 0xb7e   : > { %1872 = vrot.lane.b32.xlu1 %v4227_v44, %s3578_s20 }
 0xb82   : > { %1468 = vrot.lane.b32.xlu1 %v1466_v25, %s3579_s21 }
 0xb86   : > { %1695 = vrot.lane.b32.xlu1 %v1693_v12, %s3580_s28 }
 0xbf8   : > { %v1802_v30 = vpop.xlane.xlu0 %1801 }
 0xbf9   : > { %v1806_v31 = vsub.f32 %v1744_v16, %v1802_v30 }
 0xbfa   : > { %v1805_v32 = vpop.xlane.xlu1 %1804 }
 0xbfb   : > { %v1808_v33 = vmul.f32 1.442695, %v1806_v31  ;;  %v1807_v34 = vsub.f32 %v1794_v22, %v1805_v32 }
 0xbfd   : > { %3035 = vpow2.f32 %v1808_v33  ;;  %v1810_v35 = vmul.f32 1.442695, %v1807_v34 }
 0xbfe   : > { %v1873_v36 = vpop.permute.xlu1 %1872 }
 0xbff   : > { %3037 = vpow2.f32 %v1810_v35  ;;  %v1878_v37 = vsel %vm1152_vm4, %v1873_v36, 0 }
 0xc00   : > { %2803 = vmatpush3.bf16.msra.mxu0 %v1878_v37 }
 0xc01   : > { %2816 = vmatprep.subr.bf16.mxu0 %v3566_v17 }
 0xc02   : > { %v1469_v44 = vpop.permute.xlu1 %1468 }
 0xc03   : > { %1472 = vst.msk [vmem:[#allocation3] sm:$0xff] %vm1471_vm5, %v1469_v44  ;;  %v2624_v44 = vld [vmem:[%s751_s18] ss:$0 sm:$0xff] }
 0xc06   : > { %v1696_v20 = vpop.permute.xlu1 %1695 }
 0xc07   : > { %v3036_v24 = vpop.eup %3035  ;;  %1699 = vst.msk [vmem:[#allocation3] sm:$0xff] %vm1698_vm6, %v1696_v20 }
 0xc08   : > { %v1812_v25 = vsel %vm1027_vm3, %v3036_v24, 0.0 }
 0xc09   : > { %v3038_v38 = vpop.eup %3037  ;;  %1813 = vadd.xlane.f32.xlu0 %v1812_v25 }
 0xc0a   : > { %v1815_v39 = vsel %vm1027_vm3, %v3038_v38, 0.0 }
 0xc0d   : > { %1816 = vadd.xlane.f32.xlu0 %v1815_v39 }
 0xc23   : > { %1824 = vrot.lane.b32.xlu0 %v4225_v41, %s3578_s20 }
 0xc96   : > { %v1814_v40 = vpop.xlane.xlu0 %1813 }
 0xc97   : > { %3039 = vrcp.f32 %v1814_v40 }
 0xc9a   : > { %v1817_v42 = vpop.xlane.xlu0 %1816 }
 0xc9b   : > { %3041 = vrcp.f32 %v1817_v42 }
 0xc9e   : > { %v1825_v43 = vpop.permute.xlu0 %1824 }
 0xc9f   : > { %v1830_v45 = vsel %vm1152_vm4, %v1825_v43, 0 }
 0xca0   : > { %2797 = vmatpush3.bf16.msra.mxu1 %v1830_v45 }
 0xca1   : > { %v3040_v46 = vpop.eup %3039  ;;  %2808 = vmatprep.subr.bf16.mxu1 %v3566_v17 }
 0xca2   : > { %v1820_v47 = vmul.f32 %v3040_v46, %v3036_v24  ;;  %v2999_v46 = vld [vmem:[%s4184_s5] sm:$0xff]  }
 0xca4   : > { %v1822_v48 = vpack.c.bf16 %v1820_v47, %v1820_v47  ;;  %v3000_v47 = vld [vmem:[%s4184_s5 + $0x8] sm:$0xff]  }
 0xca5   : > { %v3042_v50 = vpop.eup %3041 }
 0xca6   : > { %v1821_v51 = vmul.f32 %v3042_v50, %v3038_v38  ;;  %2799 = vmatmul.mubr.msk.bf16.vlgmr.msra.gmra.mrb[24].mxu1 %vm1027_vm3, %v1822_v48  ;;  %v2625_v38 = vld [vmem:[%s4544_s27] ss:$0 sm:$0xff]  ;;  %v3001_v48 = vld [vmem:[%s4184_s5 + $0x10] sm:$0xff]   ;;  %v3002_v50 = vld [vmem:[%s4184_s5 + $0x18] sm:$0xff]  }
 0xca7   : > { %2812 = vmatprep.mubr.msk.bf16.mxu1 %vm3567_vm2, %v3566_v17  ;;  %2809 = vmatpush3.bf16.msra.mxu1 %v2995_v53  ;;  %v3005_v53 = vld [vmem:[%s4184_s5 + $0x30] sm:$0xff]  }
 0xca8   : > { %v1823_v41 = vpack.c.bf16 %v1821_v51, %v1821_v51  ;;  %2810 = vmatprep.subr.bf16.mxu1 %v3566_v17  ;;  %v3003_v51 = vld [vmem:[%s4184_s5 + $0x20] sm:$0xff]  }
 0xcaa   : > { %2805 = vmatmul.mubr.msk.bf16.vlgmr.msra.gmra.mrb[36].mxu0 %vm1027_vm3, %v1823_v41  ;;  %v3004_v41 = vld [vmem:[%s4184_s5 + $0x28] sm:$0xff]  }
 0xcab   : > { %2820 = vmatprep.mubr.msk.bf16.mxu0 %vm3567_vm2, %v3566_v17  ;;  %2811 = vmatpush3.bf16.msra.mxu1 %v2996_v52  ;;  %v3006_v52 = vld [vmem:[%s4184_s5 + $0x38] sm:$0xff]  }
 0xcac   : > { %2824 = vmatprep.subr.bf16.mxu1 %v3566_v17  ;;  %2817 = vmatpush3.bf16.msra.mxu0 %v2997_v28 }
 0xcad   : > { %2818 = vmatprep.subr.bf16.mxu0 %v3566_v17 }
 0xcb0   : > { %2819 = vmatpush3.bf16.msra.mxu0 %v2998_v29 }
 0xd79   : > { %v1866_v54 = vpop.f32.mrb[24].mxu1 }
 0xd7a   : > { %v2800_v55 = vpop.f32.mrb[25].mxu1 }
 0xd7b   : > { %v1869_v56 = vpop.f32.mrb[26].mxu1 }
 0xd7c   : > { %v2801_v57 = vpop.f32.mrb[27].mxu1 }
 0xd7d   : > { %v1914_v58 = vpop.f32.mrb[36].mxu0 }
 0xd7e   : > { %v1920_v59 = vpack.c.bf16 %v1914_v58, %v1866_v54  ;;  %v2806_v60 = vpop.f32.mrb[37].mxu0  ;;  %v2627_v54 = vld [vmem:[%s776_s17] ss:$0 sm:$0xff] }
 0xd7f   : > { %v1917_v61 = vpop.f32.mrb[38].mxu0 }
 0xd80   : > { %1922 = vrot.lane.b32.xlu0 %v1920_v59, %s3581_s25  ;;  %v2807_v62 = vpop.f32.mrb[39].mxu0 }
 0xdf2   : > { %v1923_v63 = vpop.permute.xlu0 %1922 }
 0xdf3   : > { %1926 = vst.msk [vmem:[#allocation3] sm:$0xff] %vm1925_vm7, %v1923_v63 }
 0xdfa   : > { %v1927_v0 = vld [vmem:[#allocation3] sm:$0xff] }
 0xdfb   : > { %2813 = vmatmul.mubr.msk.bf16.vlgmr.msra.gmra.mrb[28].mxu1 %vm900_vm1, %v1927_v0 }
 0xdfc   : > { %2840 = vmatprep.mubr.msk.bf16.mxu1 %vm3567_vm2, %v3566_v17  ;;  %2825 = vmatpush3.bf16.msra.mxu1 %v2999_v46 }
 0xdfd   : > { %2826 = vmatprep.subr.bf16.mxu1 %v3566_v17 }
 0xe00   : > { %2827 = vmatpush3.bf16.msra.mxu1 %v3000_v47 }
 0xe01   : > { %2828 = vmatprep.subr.bf16.mxu1 %v3566_v17 }
 0xe04   : > { %2829 = vmatpush3.bf16.msra.mxu1 %v3001_v48 }
 0xe05   : > { %2830 = vmatprep.subr.bf16.mxu1 %v3566_v17 }
 0xe08   : > { %2831 = vmatpush3.bf16.msra.mxu1 %v3002_v50 }
 0xe09   : > { %2832 = vmatprep.subr.bf16.mxu1 %v3566_v17 }
 0xe0c   : > { %2833 = vmatpush3.bf16.msra.mxu1 %v3003_v51 }
 0xe0d   : > { %2834 = vmatprep.subr.bf16.mxu1 %v3566_v17 }
 0xe10   : > { %2835 = vmatpush3.bf16.msra.mxu1 %v3004_v41 }
 0xe11   : > { %2836 = vmatprep.subr.bf16.mxu1 %v3566_v17 }
 0xe14   : > { %2837 = vmatpush3.bf16.msra.mxu1 %v3005_v53 }
 0xe15   : > { %2838 = vmatprep.subr.bf16.mxu1 %v3566_v17 }
 0xe18   : > { %2839 = vmatpush3.bf16.msra.mxu1 %v3006_v52 }
 0xece   : > { %v1988_v1 = vpop.f32.mrb[28].mxu1 }
 0xecf   : > { %v1989_v4 = vadd.f32 %v2620_v49, %v1988_v1  ;;  %v2814_v5 = vpop.f32.mrb[29].mxu1 }
 0xed0   : > { %v1991_v7 = vpop.f32.mrb[30].mxu1 }
 0xed1   : > { %v1995_v8 = vadd.f32 %v1989_v4, %v4192_v2  ;;  %v1992_v9 = vadd.f32 %v2620_v49, %v1991_v7  ;;  %v2815_v10 = vpop.f32.mrb[31].mxu1 }
 0xed3   : > { %v2050_v11 = vadd.f32 %v2626_v6, %v1995_v8  ;;  %v1996_v12 = vadd.f32 %v1992_v9, %v4194_v3  ;;  %v1999_v13 = vsel %vm900_vm1, %v1995_v8, 0.0 }
 0xed4   : > { %2000 = vadd.xlane.f32.xlu1 %v1999_v13 }
 0xed5   : > { %2052 = vst.msk [vmem:[#allocation2] sm:$0xff] %vm900_vm1, %v2050_v11  ;;  %v2051_v14 = vadd.f32 %v2626_v6, %v1996_v12  ;;  %v2002_v15 = vsel %vm900_vm1, %v1996_v12, 0.0 }
 0xed6   : > { %2003 = vadd.xlane.f32.xlu0 %v2002_v15 }
 0xed7   : > { %2053 = vst.msk [vmem:[#allocation2 + $0x8] sm:$0xff] %vm900_vm1, %v2051_v14 }
 0xedc   : > { %v2135_v10 = vld [vmem:[#allocation2] sm:$0xff] }
 0xede   : > { %v2136_v14 = vld [vmem:[#allocation2 + $0x8] sm:$0xff] }
 0xf61   : > { %v2001_v16 = vpop.xlane.xlu1 %2000 }
 0xf62   : > { %v2005_v2 = vmul.f32 0.03125, %v2001_v16 }
 0xf63   : > { %v2004_v18 = vpop.xlane.xlu0 %2003 }
 0xf64   : > { %v2007_v19 = vsub.f32 %v1995_v8, %v2005_v2  ;;  %v2006_v21 = vmul.f32 0.03125, %v2004_v18 }
 0xf66   : > { %v2008_v22 = vsub.f32 %v1996_v12, %v2006_v21  ;;  %v2009_v3 = vmul.f32 %v2007_v19, %v2007_v19 }
 0xf68   : > { %v2011_v23 = vsel %vm900_vm1, %v2009_v3, 0.0  ;;  %v2010_v26 = vmul.f32 %v2008_v22, %v2008_v22 }
 0xf69   : > { %2012 = vadd.xlane.f32.xlu0 %v2011_v23 }
 0xf6a   : > { %v2014_v27 = vsel %vm900_vm1, %v2010_v26, 0.0 }
 0xf6d   : > { %2015 = vadd.xlane.f32.xlu0 %v2014_v27 }
 0xff6   : > { %v2013_v30 = vpop.xlane.xlu0 %2012 }
 0xff7   : > { %v2017_v31 = vmul.f32 0.03125, %v2013_v30 }
 0xff9   : > { %v2019_v32 = vadd.f32 1e-05, %v2017_v31 }
 0xffa   : > { %v2016_v33 = vpop.xlane.xlu0 %2015 }
 0xffb   : > { %3043 = vrsqrt.f32 %v2019_v32  ;;  %v2018_v34 = vmul.f32 0.03125, %v2016_v33 }
 0xffd   : > { %v2020_v35 = vadd.f32 1e-05, %v2018_v34 }
 0xfff   : > { %3045 = vrsqrt.f32 %v2020_v35 }
0x1005   : > { %v3044_v36 = vpop.eup %3043 }
0x1006   : > { %v2023_v37 = vmul.f32 %v3044_v36, %v2007_v19 }
0x1008   : > { %v2031_v24 = vmul.f32 %v2624_v44, %v2023_v37 }
0x1009   : > { %v3046_v20 = vpop.eup %3045 }
0x100a   : > { %v2024_v25 = vmul.f32 %v3046_v20, %v2008_v22  ;;  %v2039_v40 = vadd.f32 %v2625_v38, %v2031_v24 }
0x100c   : > { %v2032_v39 = vmul.f32 %v2624_v44, %v2024_v25 }
0x100e   : > { %v2040_v42 = vadd.f32 %v2625_v38, %v2032_v39 }
0x1010   : > { %v2041_v43 = vpack.c.bf16 %v2040_v42, %v2039_v40 }
0x1012   : > { %2042 = vst.msk [vmem:[#allocation4] sm:$0xff] %vm900_vm1, %v2041_v43 }
0x1019   : > { %v2054_v45 = vld [vmem:[#allocation4] sm:$0xff] }
0x101a   : > { %2821 = vmatmul.mubr.msk.bf16.vlgmr.msra.gmra.mrb[40].mxu0 %vm900_vm1, %v2054_v45 }
0x10ed   : > { %v2116_v55 = vpop.f32.mrb[40].mxu0 }
0x10ee   : > { %v2117_v56 = vadd.f32 %v2627_v54, %v2116_v55  ;;  %v2822_v57 = vpop.f32.mrb[41].mxu0 }
0x10ef   : > { %v2119_v58 = vpop.f32.mrb[42].mxu0 }
0x10f0   : > { %v2123_v59 = vmul.f32 -1.702, %v2117_v56  ;;  %v2120_v60 = vadd.f32 %v2627_v54, %v2119_v58  ;;  %v2823_v61 = vpop.f32.mrb[43].mxu0 }
0x10f2   : > { %v2125_v62 = vmul.f32 1.442695, %v2123_v59  ;;  %v2124_v63 = vmul.f32 -1.702, %v2120_v60 }
0x10f4   : > { %3047 = vpow2.f32 %v2125_v62  ;;  %v2127_v0 = vmul.f32 1.442695, %v2124_v63 }
0x10f6   : > { %3049 = vpow2.f32 %v2127_v0 }
0x10fe   : > { %v3048_v49 = vpop.eup %3047 }
0x10ff   : > { %v2129_v1 = vadd.f32 1.0, %v3048_v49 }
0x1100   : > { %v3050_v17 = vpop.eup %3049 }
0x1101   : > { %3051 = vrcp.f32 %v2129_v1  ;;  %v2130_v4 = vadd.f32 1.0, %v3050_v17 }
0x1103   : > { %3053 = vrcp.f32 %v2130_v4 }
0x110b   : > { %v3052_v5 = vpop.eup %3051 }
0x110c   : > { %v2133_v7 = vmul.f32 %v3052_v5, %v2117_v56 }
0x110d   : > { %v3054_v6 = vpop.eup %3053 }
0x110e   : > { %v2134_v8 = vmul.f32 %v3054_v6, %v2120_v60 }
0x1110   : > { %v2137_v9 = vpack.c.bf16 %v2134_v8, %v2133_v7 }
0x1112   : > { %2841 = vmatmul.mubr.bf16.vlgmr.msra.gmra.mrb[32].mxu1 %v2137_v9 }
0x11e4   : > { %2251 = sbr.rel (!%p2247_p2) target bundleno = 4595 (0x11f3), region = 136 }
0x11e5   : > { %v2236_v11 = vpop.f32.mrb[32].mxu1 }
0x11e6   : > { %v2243_v12 = vadd.f32 %v2236_v11, %v2135_v10  ;;  %v2842_v13 = vpop.f32.mrb[33].mxu1 }
0x11e7   : > { %v2239_v15 = vpop.f32.mrb[34].mxu1 }
0x11e8   : > { %2245 = vst.msk [vmem:[#allocation2] sm:$0xff] %vm900_vm1, %v2243_v12  ;;  %v2244_v16 = vadd.f32 %v2239_v15, %v2136_v14  ;;  %v2843_v2 = vpop.f32.mrb[35].mxu1 }
0x11ea   : > { %2246 = vst.msk [vmem:[#allocation2 + $0x8] sm:$0xff] %vm900_vm1, %v2244_v16 }
0x11ef   : > { %v2252_v18 = vld [vmem:[#allocation2] sm:$0xff] }
0x11f0   : > { %2254 = vst.msk [vmem:[#allocation26] sm:$0xff] %vm900_vm1, %v2252_v18 }
0x11f1   : > { %v2253_v19 = vld [vmem:[#allocation2 + $0x8] sm:$0xff] }
0x11f2   : > { %2255 = vst.msk [vmem:[#allocation26 + $0x8] sm:$0xff] %vm900_vm1, %v2253_v19 }
0x11f3 PF: > { %p2920_p5 = scmp.eq.s32.totalorder %s3929_s24, 1  ;;  %s3582_s14 = smov [#allocation26]  }
0x11f4   : > { %s2265_s13 = sshll.u32 %s3582_s14, 4  ;;  %s2266_s13 = int_to_ptr.vmem [resolvable:$true] %s2265_s13 }
0x11f5   : > { %s3443_s18 = scalar_lea.vmem %s2266_s13, 256  ;;  %p3450_p13 = scmp.lt.s32.totalorder %s2266_s13, %s2266_s13 }
0x11f6   : > { %p3444_p10 = scmp.ne.s32.totalorder %s2266_s13, %s3443_s18  ;;  %p3451_p8 = scmp.lt.s32.totalorder %s3443_s18, %s3443_s18 }
0x11f8   : > { %p3445_p1 = pnand %p3444_p10, %p2920_p5  ;;  %p3452_p6 = por %p3451_p8, %p3450_p13 }
0x11fa   : > { %p3446_p4 = pneg %p3445_p1 }
0x11fc   : > { %p3453_p11 = pnand %p3452_p6, %p3446_p4 }
0x11fe   : > { %3456 = shalt.err (!%p3453_p11)
}
0x11ff   : > { %s4546_s17 = sld [smem:[#allocation47_spill]] }
0x1205   : > { %s3457_s5 = scalar_lea.hbm %s4546_s17, 256 }
0x1206   : > { %p3458_p3 = scmp.ne.s32.totalorder %s4546_s17, %s3457_s5  ;;  %p3463_p12 = scmp.lt.u32.totalorder %s3457_s5, %s4546_s17 }
0x1208   : > { %p3459_p0 = pnand %p3458_p3, %p2920_p5 }
0x120a   : > { %p3460_p9 = pneg %p3459_p0 }
0x120c   : > { %p3465_p7 = pnand %p3463_p12, %p3460_p9 }
0x120e   : > { %3468 = shalt.err (!%p3465_p7)
}
0x120f   : > { %s3583_s1 = smov 128  }
0x1210   : > { %2873 = dma.vmem_to_hbm [thread:$0]  (%p2920_p5), %s2266_s13, 256, %s4546_s17, [#allocation7], %s3583_s1, %s3583_s1, %s3579_s21  }
0x1211   : > { %3522 = dma.done.wait (%p2920_p5), [#allocation7], 256  }
0x1212   : > { %3524 = vsyncadd (%p2920_p5), [#allocation7], 4294967040 }
0x1213 PF: > { %s43_s30 = sadd.s32 1, %s3547_s30   ;;  %s4547_s28 = sld [smem:[#allocation35_spill]] }
0x1214   : > { %p40_p2 = scmp.ge.s32.totalorder %s43_s30, 4   ;;  %s4548_s27 = sld [smem:[#allocation38_spill]] }
0x1215   : > { %s4549_s8 = sld [smem:[#allocation37_spill]]  ;;  %s4550_s25 = smov %s3531_s26 }
0x1216   :  { %42 = sbr.rel (!%p40_p2) target bundleno = 26 (0x1a), region = 259 }
0x1219   : > { %s4551_s26 = smov %s4547_s28  ;;  %s4552_s28 = smov %s3543_s29 }
0x121b   : > { %s4553_s29 = smov %s4549_s8 }
0x121d   :  { %2281 = vsyncpa [#allocation6], 1 }
0x121e   :  { %2283 = vsyncpa [#allocation6 + $0x1], 1 }
0x121f   :  { %2284 = vsyncpa [#allocation9], 1 }
0x1220   :  { %2286 = vsyncpa [#allocation9 + $0x1], 1 }
0x1221   :  { %2287 = vsyncpa [#allocation12], 1 }
0x1222   :  { %2289 = vsyncpa [#allocation12 + $0x1], 1 }
0x1223   :  { %2290 = vsyncpa [#allocation15], 1 }
0x1224   :  { %2292 = vsyncpa [#allocation15 + $0x1], 1 }
0x1225   :  { %2293 = vsyncpa [#allocation18], 1 }
0x1226   :  { %2295 = vsyncpa [#allocation18 + $0x1], 1 }
0x1227   :  { %2296 = vsyncpa [#allocation21], 1 }
0x1228   :  { %2298 = vsyncpa [#allocation21 + $0x1], 1 }
0x1229   :  { %2299 = vsyncpa [#allocation24], 1 }
0x122a   :  { %2301 = vsyncpa [#allocation24 + $0x1], 1 }
0x122b   :  { %2302 = vsyncpa [#allocation7], 1 }
0x122c   :  { %2304 = vsyncpa [#allocation7 + $0x1], 1 }

</bundles_post_ra>
